<compile_context>
chip_gen: v6e
topology: v6e:2x2x1
jax: 0.10.0
libtpu: 0.0.40
codegen_flags: <defaults>
</compile_context>

<pallas_src>
import functools

import jax
import jax.numpy as jnp
from jax.experimental import pallas as pl
from jax.experimental.pallas import tpu as pltpu


# ---------------------------------------------------------------------------
# Fused SSLnet kernel
# ---------------------------------------------------------------------------
def _sslnet_kernel(x_ref, w1_ref, b1_ref, w2_ref, b2_ref,
                   wdc_ref, bd_ref,                   # VMEM
                   wc_ref, bc_ref, bs_ref,            # SMEM (tiny 1-D scalars)
                   a1_ref, sps_ref, son_ref, doa_ref):
    Cc = bc_ref.shape[0]
    Bp, D = sps_ref.shape

    # ----------------- ssnet: two dense layers (bf16 MXU, f32 accum) --------
    x = x_ref[...]                                            # (Bp, F_in) bf16
    h = jnp.dot(x, w1_ref[...], preferred_element_type=jnp.float32)
    a1 = jnp.maximum(h + b1_ref[...], 0.0)                    # (Bp, Hp) f32
    a1_ref[...] = a1

    sps = jnp.dot(a1.astype(jnp.bfloat16), w2_ref[...],
                  preferred_element_type=jnp.float32) + b2_ref[...]
    sps_ref[...] = sps                                        # (Bp, D) f32

    # ----------------- asdnet: 1x3 "same" conv + fused heads, all in VMEM ---
    # Shifted taps with zero halo (matches PyTorch zero-padded 'same' conv);
    # tap order: wc[3c+0]=left, wc[3c+1]=center, wc[3c+2]=right (cross-corr).
    lane = jax.lax.broadcasted_iota(jnp.int32, (Bp, D), 1)
    left = jnp.where(lane == 0, 0.0, pltpu.roll(sps, shift=1, axis=1))
    right = jnp.where(lane == D - 1, 0.0,
                      pltpu.roll(sps, shift=D - 1, axis=1))   # roll(-1) == D-1

    ys = []
    for c in range(Cc):                                       # static unroll
        yc = (wc_ref[3 * c] * left
              + wc_ref[3 * c + 1] * sps
              + wc_ref[3 * c + 2] * right
              + bc_ref[c])
        ys.append(jnp.maximum(yc, 0.0))                       # (Bp, D) f32
    # Lane-concat on 128-lane boundaries -> pure vreg placement, one bf16 cast.
    y_all = jnp.concatenate(ys, axis=1).astype(jnp.bfloat16)  # (Bp, Cc*D)

    # Single MXU dot for BOTH heads: columns [0:D]=doa, column D=son pre-act.
    out = jnp.dot(y_all, wdc_ref[...],
                  preferred_element_type=jnp.float32)         # (Bp, D+128)
    doa_ref[...] = out[:, :D] + bd_ref[...]
    son_ref[...] = jax.nn.sigmoid(out[:, D:] + bs_ref[0])     # lane 0 is valid


def _full_vmem_spec(arr):
    shp = arr.shape
    return pl.BlockSpec(shp, lambda *_: (0,) * len(shp))


_SMEM_SPEC = pl.BlockSpec(memory_space=pltpu.MemorySpace.SMEM)


def sslnet_forward(x, kp, hidden):
    """Mirrors SSLnet.forward: returns (a_1, pred_sps, pred_son, pred_doa)."""
    B = x.shape[0]
    x_flat = x.reshape(B, -1)                                 # flatten NCHW

    Bp = max(8, ((B + 7) // 8) * 8)                           # sublane-full M
    # Pad + cast fused in the wrapper (XLA fuses); kernel sees bf16 directly.
    x_pad = jnp.pad(x_flat, ((0, Bp - B), (0, 0))).astype(jnp.bfloat16)

    Hp = kp["w1"].shape[1]
    D = kp["w2"].shape[1]

    a1_p, sps_p, son_p, doa_p = pl.pallas_call(
        _sslnet_kernel,
        out_shape=(
            jax.ShapeDtypeStruct((Bp, Hp), jnp.float32),      # a_1 (padded)
            jax.ShapeDtypeStruct((Bp, D), jnp.float32),       # pred_sps
            jax.ShapeDtypeStruct((Bp, 128), jnp.float32),     # pred_son slab
            jax.ShapeDtypeStruct((Bp, D), jnp.float32),       # pred_doa
        ),
        in_specs=[
            _full_vmem_spec(x_pad),
            _full_vmem_spec(kp["w1"]), _full_vmem_spec(kp["b1"]),
            _full_vmem_spec(kp["w2"]), _full_vmem_spec(kp["b2"]),
            _full_vmem_spec(kp["wdc"]), _full_vmem_spec(kp["bd"]),
            _SMEM_SPEC, _SMEM_SPEC, _SMEM_SPEC,               # wc, bc, bs
        ],
        out_specs=(
            pl.BlockSpec((Bp, Hp), lambda *_: (0, 0)),
            pl.BlockSpec((Bp, D), lambda *_: (0, 0)),
            pl.BlockSpec((Bp, 128), lambda *_: (0, 0)),
            pl.BlockSpec((Bp, D), lambda *_: (0, 0)),
        ),
    )(x_pad, kp["w1"], kp["b1"], kp["w2"], kp["b2"],
      kp["wdc"], kp["bd"], kp["wc"], kp["bc"], kp["bs"])

    a_1 = a1_p[:B, :hidden]
    pred_sps = sps_p[:B]
    pred_son = son_p[:B, :1]
    pred_doa = doa_p[:B]
    return a_1, pred_sps, pred_son, pred_doa


# ---------------------------------------------------------------------------
# Parameter setup (logical params -> one-time kernel layout)
# ---------------------------------------------------------------------------
def init_params(key, f_in, hidden, d_sps, conv_ch):
    ks = jax.random.split(key, 5)
    return {
        "w1": jax.random.normal(ks[0], (f_in, hidden), jnp.float32) * 0.02,
        "b1": jnp.zeros((hidden,), jnp.float32),
        "w2": jax.random.normal(ks[1], (hidden, d_sps), jnp.float32) * 0.02,
        "b2": jnp.zeros((d_sps,), jnp.float32),
        "wc": jax.random.normal(ks[2], (conv_ch, 3), jnp.float32) * 0.2,
        "bc": jnp.zeros((conv_ch,), jnp.float32),
        "ws": jax.random.normal(ks[3], (conv_ch * d_sps, 1), jnp.float32) * 0.02,
        "bs": jnp.zeros((1,), jnp.float32),
        "wd": jax.random.normal(ks[4], (conv_ch * d_sps, d_sps), jnp.float32) * 0.02,
        "bd": jnp.zeros((d_sps,), jnp.float32),
    }


def prepare_params(params):
    """One-time re-layout: pad hidden to 128 lanes, bf16 big weights, fuse the
    doa + son head weights into one (Cc*D, D+128) matrix (ws in column D),
    flatten tiny conv scalars to 1-D for cheap SMEM residency."""
    f_in, hidden = params["w1"].shape
    d = params["w2"].shape[1]
    cc = params["wc"].shape[0]
    hp = ((hidden + 127) // 128) * 128

    w1 = jnp.zeros((f_in, hp), jnp.bfloat16)
    w1 = w1.at[:, :hidden].set(params["w1"].astype(jnp.bfloat16))
    b1 = jnp.zeros((1, hp), jnp.float32).at[:, :hidden].set(params["b1"][None, :])
    w2 = jnp.zeros((hp, d), jnp.bfloat16)
    w2 = w2.at[:hidden, :].set(params["w2"].astype(jnp.bfloat16))

    # Combined doa/son head: [:, :d] = wd, [:, d] = ws, rest zero.
    wdc = jnp.zeros((cc * d, d + 128), jnp.float32)
    wdc = wdc.at[:, :d].set(params["wd"])
    wdc = wdc.at[:, d].set(params["ws"][:, 0])

    return {
        "w1": w1,
        "b1": b1,
        "w2": w2,
        "b2": params["b2"][None, :].astype(jnp.float32),
        "wc": params["wc"].reshape(-1).astype(jnp.float32),     # (Cc*3,) SMEM
        "bc": params["bc"].astype(jnp.float32),                 # (Cc,)   SMEM
        "bs": params["bs"].astype(jnp.float32),                 # (1,)    SMEM
        "wdc": wdc.astype(jnp.bfloat16),                        # (Cc*D, D+128)
        "bd": params["bd"][None, :].astype(jnp.float32),
    }


if __name__ == "__main__":
    # Small shapes: x is NCHW (B=2, C=4, H=16, W=16); spatial spectrum D=128.
    B, C, H, W = 2, 4, 16, 16
    HIDDEN, D_SPS, CONV_CH = 32, 128, 8

    key = jax.random.PRNGKey(0)
    kx, kp_key = jax.random.split(key)
    x = jax.random.normal(kx, (B, C, H, W), jnp.float32)

    params = init_params(kp_key, C * H * W, HIDDEN, D_SPS, CONV_CH)
    kparams = prepare_params(params)          # one-time kernel-layout weights

    fwd = jax.jit(functools.partial(sslnet_forward, hidden=HIDDEN))
    a_1, pred_sps, pred_son, pred_doa = fwd(x, kparams)
    jax.block_until_ready((a_1, pred_sps, pred_son, pred_doa))

    assert a_1.shape == (B, HIDDEN)
    assert pred_sps.shape == (B, D_SPS)
    assert pred_son.shape == (B, 1)
    assert pred_doa.shape == (B, D_SPS)
    assert all(bool(jnp.all(jnp.isfinite(t)))
               for t in (a_1, pred_sps, pred_son, pred_doa))
    assert bool(jnp.all((pred_son >= 0.0) & (pred_son <= 1.0)))

    print("KERNEL_OK")
</pallas_src>

<mosaic_0001>
module attributes {stable_mosaic.version = 11 : i64} {
  func.func @_sslnet_kernel(%arg0: memref<8x1024xbf16, #tpu.memory_space<vmem>>, %arg1: memref<1024x128xbf16, #tpu.memory_space<vmem>>, %arg2: memref<1x128xf32, #tpu.memory_space<vmem>>, %arg3: memref<128x128xbf16, #tpu.memory_space<vmem>>, %arg4: memref<1x128xf32, #tpu.memory_space<vmem>>, %arg5: memref<1024x256xbf16, #tpu.memory_space<vmem>>, %arg6: memref<1x128xf32, #tpu.memory_space<vmem>>, %arg7: memref<24xf32, #tpu.memory_space<smem>>, %arg8: memref<8xf32, #tpu.memory_space<smem>>, %arg9: memref<1xf32, #tpu.memory_space<smem>>, %arg10: memref<8x128xf32, #tpu.memory_space<vmem>>, %arg11: memref<8x128xf32, #tpu.memory_space<vmem>>, %arg12: memref<8x128xf32, #tpu.memory_space<vmem>>, %arg13: memref<8x128xf32, #tpu.memory_space<vmem>>) attributes {dimension_semantics = [], scalar_prefetch = 0 : i64, scratch_operands = 0 : i64, tpu.core_type = #tpu.core_type<tc>} {
    %c0 = arith.constant 0 : index
    %c0_0 = arith.constant 0 : index
    %0 = vector.load %arg0[%c0, %c0_0] : memref<8x1024xbf16, #tpu.memory_space<vmem>>, vector<8x1024xbf16>
    %c0_1 = arith.constant 0 : index
    %c0_2 = arith.constant 0 : index
    %1 = vector.load %arg1[%c0_1, %c0_2] : memref<1024x128xbf16, #tpu.memory_space<vmem>>, vector<1024x128xbf16>
    %cst = arith.constant dense<0.000000e+00> : vector<8x128xf32>
    %2 = tpu.matmul %0, %1, %cst {dimension_numbers = #tpu.dot_dimension_numbers<[1], [0], [0], [1], [0, 0, 1, 1], [], []>} : vector<8x1024xbf16>, vector<1024x128xbf16>, vector<8x128xf32> -> vector<8x128xf32>
    %c0_3 = arith.constant 0 : index
    %c0_4 = arith.constant 0 : index
    %3 = vector.load %arg2[%c0_3, %c0_4] : memref<1x128xf32, #tpu.memory_space<vmem>>, vector<1x128xf32>
    %4 = vector.broadcast %3 : vector<1x128xf32> to vector<8x128xf32>
    %5 = arith.addf %2, %4 : vector<8x128xf32>
    %cst_5 = arith.constant 0.000000e+00 : f32
    %6 = vector.broadcast %cst_5 : f32 to vector<8x128xf32>
    %7 = arith.maximumf %5, %6 : vector<8x128xf32>
    %c0_6 = arith.constant 0 : index
    %c0_7 = arith.constant 0 : index
    %8 = vector.load %arg10[%c0_6, %c0_7] : memref<8x128xf32, #tpu.memory_space<vmem>>, vector<8x128xf32>
    tpu.vector_store %arg10[%c0_6, %c0_7], %7 {strides = array<i32>} : memref<8x128xf32, #tpu.memory_space<vmem>>, vector<8x128xf32>,
    %9 = arith.truncf %7 : vector<8x128xf32> to vector<8x128xbf16>
    %c0_8 = arith.constant 0 : index
    %c0_9 = arith.constant 0 : index
    %10 = vector.load %arg3[%c0_8, %c0_9] : memref<128x128xbf16, #tpu.memory_space<vmem>>, vector<128x128xbf16>
    %cst_10 = arith.constant dense<0.000000e+00> : vector<8x128xf32>
    %11 = tpu.matmul %9, %10, %cst_10 {dimension_numbers = #tpu.dot_dimension_numbers<[1], [0], [0], [1], [0, 0, 1, 1], [], []>} : vector<8x128xbf16>, vector<128x128xbf16>, vector<8x128xf32> -> vector<8x128xf32>
    %c0_11 = arith.constant 0 : index
    %c0_12 = arith.constant 0 : index
    %12 = vector.load %arg4[%c0_11, %c0_12] : memref<1x128xf32, #tpu.memory_space<vmem>>, vector<1x128xf32>
    %13 = vector.broadcast %12 : vector<1x128xf32> to vector<8x128xf32>
    %14 = arith.addf %11, %13 : vector<8x128xf32>
    %c0_13 = arith.constant 0 : index
    %c0_14 = arith.constant 0 : index
    %15 = vector.load %arg11[%c0_13, %c0_14] : memref<8x128xf32, #tpu.memory_space<vmem>>, vector<8x128xf32>
    tpu.vector_store %arg11[%c0_13, %c0_14], %14 {strides = array<i32>} : memref<8x128xf32, #tpu.memory_space<vmem>>, vector<8x128xf32>,
    %16 = tpu.iota {dimensions = array<i32: 1>} : vector<8x128xi32>
    %c0_i32 = arith.constant 0 : i32
    %17 = vector.broadcast %c0_i32 : i32 to vector<8x128xi32>
    %18 = arith.cmpi eq, %16, %17 : vector<8x128xi32>
    %c1_i32 = arith.constant 1 : i32
    %19 = tpu.dynamic_rotate %14 by %c1_i32 dim 1 : vector<8x128xf32>, i32 -> vector<8x128xf32>
    %cst_15 = arith.constant 0.000000e+00 : f32
    %20 = vector.broadcast %cst_15 : f32 to vector<8x128xf32>
    %21 = arith.select %18, %20, %19 : vector<8x128xi1>, vector<8x128xf32>
    %c127_i32 = arith.constant 127 : i32
    %22 = vector.broadcast %c127_i32 : i32 to vector<8x128xi32>
    %23 = arith.cmpi eq, %16, %22 : vector<8x128xi32>
    %c127_i32_16 = arith.constant 127 : i32
    %24 = tpu.dynamic_rotate %14 by %c127_i32_16 dim 1 : vector<8x128xf32>, i32 -> vector<8x128xf32>
    %cst_17 = arith.constant 0.000000e+00 : f32
    %25 = vector.broadcast %cst_17 : f32 to vector<8x128xf32>
    %26 = arith.select %23, %25, %24 : vector<8x128xi1>, vector<8x128xf32>
    %c0_18 = arith.constant 0 : index
    %27 = memref.load %arg7[%c0_18] : memref<24xf32, #tpu.memory_space<smem>>
    %28 = vector.broadcast %27 : f32 to vector<8x128xf32>
    %29 = arith.mulf %28, %21 : vector<8x128xf32>
    %c1 = arith.constant 1 : index
    %30 = memref.load %arg7[%c1] : memref<24xf32, #tpu.memory_space<smem>>
    %31 = vector.broadcast %30 : f32 to vector<8x128xf32>
    %32 = arith.mulf %31, %14 : vector<8x128xf32>
    %33 = arith.addf %29, %32 : vector<8x128xf32>
    %c2 = arith.constant 2 : index
    %34 = memref.load %arg7[%c2] : memref<24xf32, #tpu.memory_space<smem>>
    %35 = vector.broadcast %34 : f32 to vector<8x128xf32>
    %36 = arith.mulf %35, %26 : vector<8x128xf32>
    %37 = arith.addf %33, %36 : vector<8x128xf32>
    %c0_19 = arith.constant 0 : index
    %38 = memref.load %arg8[%c0_19] : memref<8xf32, #tpu.memory_space<smem>>
    %39 = vector.broadcast %38 : f32 to vector<8x128xf32>
    %40 = arith.addf %37, %39 : vector<8x128xf32>
    %cst_20 = arith.constant 0.000000e+00 : f32
    %41 = vector.broadcast %cst_20 : f32 to vector<8x128xf32>
    %42 = arith.maximumf %40, %41 : vector<8x128xf32>
    %c3 = arith.constant 3 : index
    %43 = memref.load %arg7[%c3] : memref<24xf32, #tpu.memory_space<smem>>
    %44 = vector.broadcast %43 : f32 to vector<8x128xf32>
    %45 = arith.mulf %44, %21 : vector<8x128xf32>
    %c4 = arith.constant 4 : index
    %46 = memref.load %arg7[%c4] : memref<24xf32, #tpu.memory_space<smem>>
    %47 = vector.broadcast %46 : f32 to vector<8x128xf32>
    %48 = arith.mulf %47, %14 : vector<8x128xf32>
    %49 = arith.addf %45, %48 : vector<8x128xf32>
    %c5 = arith.constant 5 : index
    %50 = memref.load %arg7[%c5] : memref<24xf32, #tpu.memory_space<smem>>
    %51 = vector.broadcast %50 : f32 to vector<8x128xf32>
    %52 = arith.mulf %51, %26 : vector<8x128xf32>
    %53 = arith.addf %49, %52 : vector<8x128xf32>
    %c1_21 = arith.constant 1 : index
    %54 = memref.load %arg8[%c1_21] : memref<8xf32, #tpu.memory_space<smem>>
    %55 = vector.broadcast %54 : f32 to vector<8x128xf32>
    %56 = arith.addf %53, %55 : vector<8x128xf32>
    %cst_22 = arith.constant 0.000000e+00 : f32
    %57 = vector.broadcast %cst_22 : f32 to vector<8x128xf32>
    %58 = arith.maximumf %56, %57 : vector<8x128xf32>
    %c6 = arith.constant 6 : index
    %59 = memref.load %arg7[%c6] : memref<24xf32, #tpu.memory_space<smem>>
    %60 = vector.broadcast %59 : f32 to vector<8x128xf32>
    %61 = arith.mulf %60, %21 : vector<8x128xf32>
    %c7 = arith.constant 7 : index
    %62 = memref.load %arg7[%c7] : memref<24xf32, #tpu.memory_space<smem>>
    %63 = vector.broadcast %62 : f32 to vector<8x128xf32>
    %64 = arith.mulf %63, %14 : vector<8x128xf32>
    %65 = arith.addf %61, %64 : vector<8x128xf32>
    %c8 = arith.constant 8 : index
    %66 = memref.load %arg7[%c8] : memref<24xf32, #tpu.memory_space<smem>>
    %67 = vector.broadcast %66 : f32 to vector<8x128xf32>
    %68 = arith.mulf %67, %26 : vector<8x128xf32>
    %69 = arith.addf %65, %68 : vector<8x128xf32>
    %c2_23 = arith.constant 2 : index
    %70 = memref.load %arg8[%c2_23] : memref<8xf32, #tpu.memory_space<smem>>
    %71 = vector.broadcast %70 : f32 to vector<8x128xf32>
    %72 = arith.addf %69, %71 : vector<8x128xf32>
    %cst_24 = arith.constant 0.000000e+00 : f32
    %73 = vector.broadcast %cst_24 : f32 to vector<8x128xf32>
    %74 = arith.maximumf %72, %73 : vector<8x128xf32>
    %c9 = arith.constant 9 : index
    %75 = memref.load %arg7[%c9] : memref<24xf32, #tpu.memory_space<smem>>
    %76 = vector.broadcast %75 : f32 to vector<8x128xf32>
    %77 = arith.mulf %76, %21 : vector<8x128xf32>
    %c10 = arith.constant 10 : index
    %78 = memref.load %arg7[%c10] : memref<24xf32, #tpu.memory_space<smem>>
    %79 = vector.broadcast %78 : f32 to vector<8x128xf32>
    %80 = arith.mulf %79, %14 : vector<8x128xf32>
    %81 = arith.addf %77, %80 : vector<8x128xf32>
    %c11 = arith.constant 11 : index
    %82 = memref.load %arg7[%c11] : memref<24xf32, #tpu.memory_space<smem>>
    %83 = vector.broadcast %82 : f32 to vector<8x128xf32>
    %84 = arith.mulf %83, %26 : vector<8x128xf32>
    %85 = arith.addf %81, %84 : vector<8x128xf32>
    %c3_25 = arith.constant 3 : index
    %86 = memref.load %arg8[%c3_25] : memref<8xf32, #tpu.memory_space<smem>>
    %87 = vector.broadcast %86 : f32 to vector<8x128xf32>
    %88 = arith.addf %85, %87 : vector<8x128xf32>
    %cst_26 = arith.constant 0.000000e+00 : f32
    %89 = vector.broadcast %cst_26 : f32 to vector<8x128xf32>
    %90 = arith.maximumf %88, %89 : vector<8x128xf32>
    %c12 = arith.constant 12 : index
    %91 = memref.load %arg7[%c12] : memref<24xf32, #tpu.memory_space<smem>>
    %92 = vector.broadcast %91 : f32 to vector<8x128xf32>
    %93 = arith.mulf %92, %21 : vector<8x128xf32>
    %c13 = arith.constant 13 : index
    %94 = memref.load %arg7[%c13] : memref<24xf32, #tpu.memory_space<smem>>
    %95 = vector.broadcast %94 : f32 to vector<8x128xf32>
    %96 = arith.mulf %95, %14 : vector<8x128xf32>
    %97 = arith.addf %93, %96 : vector<8x128xf32>
    %c14 = arith.constant 14 : index
    %98 = memref.load %arg7[%c14] : memref<24xf32, #tpu.memory_space<smem>>
    %99 = vector.broadcast %98 : f32 to vector<8x128xf32>
    %100 = arith.mulf %99, %26 : vector<8x128xf32>
    %101 = arith.addf %97, %100 : vector<8x128xf32>
    %c4_27 = arith.constant 4 : index
    %102 = memref.load %arg8[%c4_27] : memref<8xf32, #tpu.memory_space<smem>>
    %103 = vector.broadcast %102 : f32 to vector<8x128xf32>
    %104 = arith.addf %101, %103 : vector<8x128xf32>
    %cst_28 = arith.constant 0.000000e+00 : f32
    %105 = vector.broadcast %cst_28 : f32 to vector<8x128xf32>
    %106 = arith.maximumf %104, %105 : vector<8x128xf32>
    %c15 = arith.constant 15 : index
    %107 = memref.load %arg7[%c15] : memref<24xf32, #tpu.memory_space<smem>>
    %108 = vector.broadcast %107 : f32 to vector<8x128xf32>
    %109 = arith.mulf %108, %21 : vector<8x128xf32>
    %c16 = arith.constant 16 : index
    %110 = memref.load %arg7[%c16] : memref<24xf32, #tpu.memory_space<smem>>
    %111 = vector.broadcast %110 : f32 to vector<8x128xf32>
    %112 = arith.mulf %111, %14 : vector<8x128xf32>
    %113 = arith.addf %109, %112 : vector<8x128xf32>
    %c17 = arith.constant 17 : index
    %114 = memref.load %arg7[%c17] : memref<24xf32, #tpu.memory_space<smem>>
    %115 = vector.broadcast %114 : f32 to vector<8x128xf32>
    %116 = arith.mulf %115, %26 : vector<8x128xf32>
    %117 = arith.addf %113, %116 : vector<8x128xf32>
    %c5_29 = arith.constant 5 : index
    %118 = memref.load %arg8[%c5_29] : memref<8xf32, #tpu.memory_space<smem>>
    %119 = vector.broadcast %118 : f32 to vector<8x128xf32>
    %120 = arith.addf %117, %119 : vector<8x128xf32>
    %cst_30 = arith.constant 0.000000e+00 : f32
    %121 = vector.broadcast %cst_30 : f32 to vector<8x128xf32>
    %122 = arith.maximumf %120, %121 : vector<8x128xf32>
    %c18 = arith.constant 18 : index
    %123 = memref.load %arg7[%c18] : memref<24xf32, #tpu.memory_space<smem>>
    %124 = vector.broadcast %123 : f32 to vector<8x128xf32>
    %125 = arith.mulf %124, %21 : vector<8x128xf32>
    %c19 = arith.constant 19 : index
    %126 = memref.load %arg7[%c19] : memref<24xf32, #tpu.memory_space<smem>>
    %127 = vector.broadcast %126 : f32 to vector<8x128xf32>
    %128 = arith.mulf %127, %14 : vector<8x128xf32>
    %129 = arith.addf %125, %128 : vector<8x128xf32>
    %c20 = arith.constant 20 : index
    %130 = memref.load %arg7[%c20] : memref<24xf32, #tpu.memory_space<smem>>
    %131 = vector.broadcast %130 : f32 to vector<8x128xf32>
    %132 = arith.mulf %131, %26 : vector<8x128xf32>
    %133 = arith.addf %129, %132 : vector<8x128xf32>
    %c6_31 = arith.constant 6 : index
    %134 = memref.load %arg8[%c6_31] : memref<8xf32, #tpu.memory_space<smem>>
    %135 = vector.broadcast %134 : f32 to vector<8x128xf32>
    %136 = arith.addf %133, %135 : vector<8x128xf32>
    %cst_32 = arith.constant 0.000000e+00 : f32
    %137 = vector.broadcast %cst_32 : f32 to vector<8x128xf32>
    %138 = arith.maximumf %136, %137 : vector<8x128xf32>
    %c21 = arith.constant 21 : index
    %139 = memref.load %arg7[%c21] : memref<24xf32, #tpu.memory_space<smem>>
    %140 = vector.broadcast %139 : f32 to vector<8x128xf32>
    %141 = arith.mulf %140, %21 : vector<8x128xf32>
    %c22 = arith.constant 22 : index
    %142 = memref.load %arg7[%c22] : memref<24xf32, #tpu.memory_space<smem>>
    %143 = vector.broadcast %142 : f32 to vector<8x128xf32>
    %144 = arith.mulf %143, %14 : vector<8x128xf32>
    %145 = arith.addf %141, %144 : vector<8x128xf32>
    %c23 = arith.constant 23 : index
    %146 = memref.load %arg7[%c23] : memref<24xf32, #tpu.memory_space<smem>>
    %147 = vector.broadcast %146 : f32 to vector<8x128xf32>
    %148 = arith.mulf %147, %26 : vector<8x128xf32>
    %149 = arith.addf %145, %148 : vector<8x128xf32>
    %c7_33 = arith.constant 7 : index
    %150 = memref.load %arg8[%c7_33] : memref<8xf32, #tpu.memory_space<smem>>
    %151 = vector.broadcast %150 : f32 to vector<8x128xf32>
    %152 = arith.addf %149, %151 : vector<8x128xf32>
    %cst_34 = arith.constant 0.000000e+00 : f32
    %153 = vector.broadcast %cst_34 : f32 to vector<8x128xf32>
    %154 = arith.maximumf %152, %153 : vector<8x128xf32>
    %155 = tpu.concatenate %42, %58, %74, %90, %106, %122, %138, %154 in 1 : vector<8x128xf32>, vector<8x128xf32>, vector<8x128xf32>, vector<8x128xf32>, vector<8x128xf32>, vector<8x128xf32>, vector<8x128xf32>, vector<8x128xf32> -> vector<8x1024xf32>
    %156 = arith.truncf %155 : vector<8x1024xf32> to vector<8x1024xbf16>
    %c0_35 = arith.constant 0 : index
    %c0_36 = arith.constant 0 : index
    %157 = vector.load %arg5[%c0_35, %c0_36] : memref<1024x256xbf16, #tpu.memory_space<vmem>>, vector<1024x256xbf16>
    %cst_37 = arith.constant dense<0.000000e+00> : vector<8x256xf32>
    %158 = tpu.matmul %156, %157, %cst_37 {dimension_numbers = #tpu.dot_dimension_numbers<[1], [0], [0], [1], [0, 0, 1, 1], [], []>} : vector<8x1024xbf16>, vector<1024x256xbf16>, vector<8x256xf32> -> vector<8x256xf32>
    %159 = vector.extract_strided_slice %158 {offsets = [0, 0], sizes = [8, 128], strides = [1, 1]} : vector<8x256xf32> to vector<8x128xf32>
    %c0_38 = arith.constant 0 : index
    %c0_39 = arith.constant 0 : index
    %160 = vector.load %arg6[%c0_38, %c0_39] : memref<1x128xf32, #tpu.memory_space<vmem>>, vector<1x128xf32>
    %161 = vector.broadcast %160 : vector<1x128xf32> to vector<8x128xf32>
    %162 = arith.addf %159, %161 : vector<8x128xf32>
    %c0_40 = arith.constant 0 : index
    %c0_41 = arith.constant 0 : index
    %163 = vector.load %arg13[%c0_40, %c0_41] : memref<8x128xf32, #tpu.memory_space<vmem>>, vector<8x128xf32>
    tpu.vector_store %arg13[%c0_40, %c0_41], %162 {strides = array<i32>} : memref<8x128xf32, #tpu.memory_space<vmem>>, vector<8x128xf32>,
    %164 = vector.extract_strided_slice %158 {offsets = [0, 128], sizes = [8, 128], strides = [1, 1]} : vector<8x256xf32> to vector<8x128xf32>
    %c0_42 = arith.constant 0 : index
    %165 = memref.load %arg9[%c0_42] : memref<1xf32, #tpu.memory_space<smem>>
    %166 = vector.broadcast %165 : f32 to vector<8x128xf32>
    %167 = arith.addf %164, %166 : vector<8x128xf32>
    %168 = arith.negf %167 : vector<8x128xf32>
    %169 = math.exp %168 : vector<8x128xf32>
    %cst_43 = arith.constant 1.000000e+00 : f32
    %170 = vector.broadcast %cst_43 : f32 to vector<8x128xf32>
    %171 = arith.addf %170, %169 : vector<8x128xf32>
    %172 = arith.divf %170, %171 : vector<8x128xf32>
    %c0_44 = arith.constant 0 : index
    %c0_45 = arith.constant 0 : index
    %173 = vector.load %arg12[%c0_44, %c0_45] : memref<8x128xf32, #tpu.memory_space<vmem>>, vector<8x128xf32>
    tpu.vector_store %arg12[%c0_44, %c0_45], %172 {strides = array<i32>} : memref<8x128xf32, #tpu.memory_space<vmem>>, vector<8x128xf32>,
    return
  }
}

</mosaic_0001>

<bundles_post_ra>
// kernel: sslnet_forward.1
= control target key start
LH: loop header
LB: loop body
LE: loop exit
PB: predicated region body
PF: predicated region fallthrough
CT: control target
= control target key end

     0   :  { %s3013_s0 = inlined_call_operand.vmem [shape: bf16[8,1024], index: 0, kind: input, shape index: {}]   ;;  %s3014_s1 = inlined_call_operand.hbm [shape: bf16[1024,128], index: 1, kind: input, shape index: {}]   ;;  %s3015_s2 = inlined_call_operand.vmem [shape: f32[1,128], index: 2, kind: input, shape index: {}]   ;;  %s3016_s3 = inlined_call_operand.vmem [shape: bf16[128,128], index: 3, kind: input, shape index: {}]   ;;  %s3017_s4 = inlined_call_operand.vmem [shape: f32[1,128], index: 4, kind: input, shape index: {}]   ;;  %s3018_s5 = inlined_call_operand.hbm [shape: bf16[1024,256], index: 5, kind: input, shape index: {}]   ;;  %s3019_s6 = inlined_call_operand.vmem [shape: f32[1,128], index: 6, kind: input, shape index: {}]   ;;  %s3020_s7 = inlined_call_operand.vmem [shape: f32[24], index: 7, kind: input, shape index: {}]   ;;  %s3021_s8 = inlined_call_operand.vmem [shape: f32[8], index: 8, kind: input, shape index: {}]   ;;  %s3022_s9 = inlined_call_operand.<no memory space> [shape: f32[1], index: 9, kind: input, shape index: {}]   ;;  %s3023_s10 = inlined_call_operand.vmem [shape: f32[8,128], index: 10, kind: output, shape index: {0}]   ;;  %s3024_s11 = inlined_call_operand.vmem [shape: f32[8,128], index: 11, kind: output, shape index: {1}]   ;;  %s3025_s12 = inlined_call_operand.vmem [shape: f32[8,128], index: 12, kind: output, shape index: {2}]   ;;  %s3026_s13 = inlined_call_operand.vmem [shape: f32[8,128], index: 13, kind: output, shape index: {3}]  }
   0x1   :  { %3027 = sst [smem:[#allocation15_spill]] %s3025_s12 }
   0x2   :  { %3028 = sst [smem:[#allocation16_spill]] %s3026_s13 }
   0x3   :  { %20 = vsyncpa [#allocation4], 0 }
   0x4   :  { %21 = vsyncpa [#allocation7], 0 }
   0x5   :  { %22 = vsyncpa [#allocation5], 0 }
   0x6   :  { %23 = vsyncpa [#allocation10], 0  ;;  %s2748_s25 = smov [#allocation3]  }
   0x7   :  { %s31_s26 = sshll.u32 %s2748_s25, 4  ;;  %s32_s26 = int_to_ptr.vmem [resolvable:$true] %s31_s26 }
   0x8   :  { %s2684_s27 = scalar_lea.vmem %s32_s26, 8192  ;;  %p2689_p1 = scmp.lt.s32.totalorder %s32_s26, %s32_s26 }
   0x9   :  { %p2685_p0 = scmp.ne.s32.totalorder %s32_s26, %s2684_s27  ;;  %p2690_p2 = scmp.lt.s32.totalorder %s2684_s27, %s2684_s27 }
   0xb   :  { %p2691_p3 = por %p2690_p2, %p2689_p1 }
   0xd   :  { %p2692_p4 = pnand %p2691_p3, %p2685_p0 }
   0xf   :  { %2695 = shalt.err (!%p2692_p4)
}
  0x10   :  { %s2749_s28 = smov 64   ;;  %s2750_s29 = smov 4  }
  0x11   :  { %37 = dma.hbm_to_vmem [thread:$0]  %s3014_s1, 8192, %s32_s26, [#allocation4], %s2749_s28, %s2749_s28, %s2750_s29  }
  0x12   :  { %s2751_s15 = smov [#allocation6]  }
  0x13   :  { %s49_s16 = sshll.u32 %s2751_s15, 4  ;;  %s50_s16 = int_to_ptr.vmem [resolvable:$true] %s49_s16 }
  0x14   :  { %s2704_s17 = scalar_lea.vmem %s50_s16, 16384  ;;  %p2709_p6 = scmp.lt.s32.totalorder %s50_s16, %s50_s16 }
  0x15   :  { %p2705_p5 = scmp.ne.s32.totalorder %s50_s16, %s2704_s17  ;;  %p2710_p7 = scmp.lt.s32.totalorder %s2704_s17, %s2704_s17 }
  0x17   :  { %p2711_p8 = por %p2710_p7, %p2709_p6 }
  0x19   :  { %p2712_p9 = pnand %p2711_p8, %p2705_p5 }
  0x1b   :  { %2715 = shalt.err (!%p2712_p9)
}
  0x1c   :  { %s2752_s18 = smov 128   ;;  %s2753_s19 = smov 8  }
  0x1d   :  { %55 = dma.hbm_to_vmem [thread:$0]  %s3018_s5, 16384, %s50_s16, [#allocation7], %s2752_s18, %s2752_s18, %s2753_s19  }
  0x1e   :  { %s64_s1 = sshll.u32 %s3020_s7, 4  ;;  %s74_s26 = sshll.u32 %s3021_s8, 4  ;;  %s65_s1 = int_to_ptr.vmem [resolvable:$true] %s64_s1  ;;  %s75_s26 = int_to_ptr.vmem [resolvable:$true] %s74_s26 }
  0x1f   :  { %s2716_s27 = scalar_lea.vmem %s65_s1, 16  ;;  %p2721_p11 = scmp.lt.s32.totalorder %s65_s1, %s65_s1 }
  0x20   :  { %p2717_p10 = scmp.ne.s32.totalorder %s65_s1, %s2716_s27  ;;  %p2722_p12 = scmp.lt.s32.totalorder %s2716_s27, %s2716_s27 }
  0x22   :  { %p2723_p13 = por %p2722_p12, %p2721_p11 }
  0x24   :  { %p2724_p0 = pnand %p2723_p13, %p2717_p10 }
  0x26   :  { %2727 = shalt.err (!%p2724_p0)
}
  0x27   :  { %s2754_s28 = smov [#allocation8]   ;;  %s2728_s5 = scalar_lea.vmem %s75_s26, 16 }
  0x28   :  { %67 = dma.vmem_to_smem %s65_s1, 16, %s2754_s28, [#allocation5]  }
  0x29   :  { %p2729_p1 = scmp.ne.s32.totalorder %s75_s26, %s2728_s5  ;;  %p2733_p2 = scmp.lt.s32.totalorder %s75_s26, %s75_s26 }
  0x2a   :  { %p2734_p3 = scmp.lt.s32.totalorder %s2728_s5, %s2728_s5 }
  0x2c   :  { %p2735_p4 = por %p2734_p3, %p2733_p2 }
  0x2e   :  { %p2736_p5 = pnand %p2735_p4, %p2729_p1 }
  0x30   :  { %2739 = shalt.err (!%p2736_p5)
}
  0x31   :  { %s2755_s7 = smov [#allocation9]  }
  0x32   :  { %77 = dma.vmem_to_smem %s75_s26, 16, %s2755_s7, [#allocation10]  }
  0x33   :  { %2740 = dma.done.wait [#allocation4], 8192  }
  0x34   :  { %2741 = vsyncadd [#allocation4], 4294959104 }
  0x35   :  { %2742 = dma.done.wait [#allocation7], 16384  }
  0x36   :  { %2743 = vsyncadd [#allocation7], 4294950912 }
  0x37   :  { %2744 = dma.done.wait [#allocation5], 16  }
  0x38   :  { %2745 = vsyncadd [#allocation5], 4294967280 }
  0x39   :  { %2746 = dma.done.wait [#allocation10], 16  }
  0x3a   :  { %2747 = vsyncadd [#allocation10], 4294967280 }
  0x3b   :  { %92 = sfence }
  0x3c   :  { %v2400_v0 = vld [vmem:[#allocation3 + $0x78] sm:$0xff]   ;;  %v2404_v4 = vld [vmem:[#allocation3 + $0x70] sm:$0xff]   ;;  %v2408_v8 = vld [vmem:[#allocation3 + $0x68] sm:$0xff]   ;;  %vm2757_vm0 = vmmov 0   ;;  %s2758_s18 = smov 1   ;;  %s2895_s19 = sld [smem:[#allocation8 + $0x4]] }
  0x3d   :  { %v2401_v1 = vld [vmem:[#allocation3 + $0xf8] sm:$0xff]   ;;  %2271 = vmatprep.subr.bf16.mxu0 %v2400_v0  ;;  %v2405_v5 = vld [vmem:[#allocation3 + $0xf0] sm:$0xff]   ;;  %v2409_v9 = vld [vmem:[#allocation3 + $0xe8] sm:$0xff]   ;;  %s2897_s20 = sld [smem:[#allocation8 + $0xa]] }
  0x3e   :  { %v2402_v2 = vld [vmem:[#allocation3 + $0x38] sm:$0xff]   ;;  %2293 = vmatprep.subr.bf16.mxu1 %v2401_v1  ;;  %v2406_v6 = vld [vmem:[#allocation3 + $0x30] sm:$0xff]   ;;  %v2410_v10 = vld [vmem:[#allocation3 + $0x28] sm:$0xff]   ;;  %s2899_s21 = sld [smem:[#allocation8 + $0x1]] }
  0x3f   :  { %v2403_v3 = vld [vmem:[#allocation3 + $0xb8] sm:$0xff]   ;;  %2272 = vmatpush3.bf16.msra.mxu0 %v2402_v2  ;;  %v2407_v7 = vld [vmem:[#allocation3 + $0xb0] sm:$0xff]   ;;  %v2411_v11 = vld [vmem:[#allocation3 + $0xa8] sm:$0xff]   ;;  %s2901_s22 = sld [smem:[#allocation8 + $0x7]] }
  0x40   :  { %2294 = vmatpush3.bf16.msra.mxu1 %v2403_v3  ;;  %2273 = vmatprep.subr.bf16.mxu0 %v2404_v4  ;;  %v2412_v12 = vld [vmem:[#allocation3 + $0x60] sm:$0xff]   ;;  %v2416_v16 = vld [vmem:[#allocation3 + $0x58] sm:$0xff]   ;;  %v2420_v20 = vld [vmem:[#allocation3 + $0x50] sm:$0xff]   ;;  %s2907_s23 = sld [smem:[#allocation8 + $0xd]] }
  0x41   :  { %2295 = vmatprep.subr.bf16.mxu1 %v2405_v5  ;;  %v2413_v13 = vld [vmem:[#allocation3 + $0xe0] sm:$0xff]   ;;  %v2417_v17 = vld [vmem:[#allocation3 + $0xd8] sm:$0xff]   ;;  %v2421_v21 = vld [vmem:[#allocation3 + $0xd0] sm:$0xff]   ;;  %s2909_s1 = sld [smem:[#allocation8 + $0x13]] }
  0x42   :  { %v2414_v14 = vld [vmem:[#allocation3 + $0x20] sm:$0xff]   ;;  %v2418_v18 = vld [vmem:[#allocation3 + $0x18] sm:$0xff]   ;;  %v2422_v22 = vld [vmem:[#allocation3 + $0x10] sm:$0xff]   ;;  %s2911_s24 = sld [smem:[#allocation8 + $0x3]] }
  0x43   :  { %2274 = vmatpush3.bf16.msra.mxu0 %v2406_v6  ;;  %v2415_v15 = vld [vmem:[#allocation3 + $0xa0] sm:$0xff]   ;;  %v2419_v19 = vld [vmem:[#allocation3 + $0x98] sm:$0xff]   ;;  %v2423_v23 = vld [vmem:[#allocation3 + $0x90] sm:$0xff]   ;;  %s2913_s25 = sld [smem:[#allocation8 + $0x9]] }
  0x44   :  { %2296 = vmatpush3.bf16.msra.mxu1 %v2407_v7  ;;  %2275 = vmatprep.subr.bf16.mxu0 %v2408_v8  ;;  %v2424_v24 = vld [vmem:[#allocation3 + $0x48] sm:$0xff]   ;;  %v2428_v28 = vld [vmem:[#allocation3 + $0x40] sm:$0xff]   ;;  %v2436_v38 = vld [vmem:[#allocation3 + $0x178] sm:$0xff]   ;;  %s2915_s26 = sld [smem:[#allocation8]] }
  0x45   :  { %2297 = vmatprep.subr.bf16.mxu1 %v2409_v9  ;;  %v2425_v25 = vld [vmem:[#allocation3 + $0xc8] sm:$0xff]   ;;  %v2429_v29 = vld [vmem:[#allocation3 + $0xc0] sm:$0xff]   ;;  %v2437_v39 = vld [vmem:[#allocation3 + $0x1f8] sm:$0xff]   ;;  %s2917_s27 = sld [smem:[#allocation8 + $0x6]] }
  0x46   :  { %v2426_v26 = vld [vmem:[#allocation3 + $0x8] sm:$0xff]   ;;  %v2430_v30 = vld [vmem:[#allocation3] sm:$0xff]   ;;  %v2438_v40 = vld [vmem:[#allocation3 + $0x138] sm:$0xff]   ;;  %s2919_s28 = sld [smem:[#allocation8 + $0x5]] }
  0x47   :  { %2276 = vmatpush3.bf16.msra.mxu0 %v2410_v10  ;;  %v2427_v27 = vld [vmem:[#allocation3 + $0x88] sm:$0xff]   ;;  %v2431_v31 = vld [vmem:[#allocation3 + $0x80] sm:$0xff]   ;;  %v2439_v41 = vld [vmem:[#allocation3 + $0x1b8] sm:$0xff]   ;;  %s2921_s5 = sld [smem:[#allocation8 + $0xb]] }
  0x48   :  { %2298 = vmatpush3.bf16.msra.mxu1 %v2411_v11  ;;  %2277 = vmatprep.subr.bf16.mxu0 %v2412_v12  ;;  %v94_v32 = vld [vmem:[%s3013_s0] sm:$0xff]  ;;  %v95_v33 = vld [vmem:[%s3013_s0 + $0x8] sm:$0xff]  ;;  %v2440_v42 = vld [vmem:[#allocation3 + $0x170] sm:$0xff]   ;;  %s2923_s7 = sld [smem:[#allocation8 + $0x2]] }
  0x49   :  { %2299 = vmatprep.subr.bf16.mxu1 %v2413_v13  ;;  %v2030_v34 = vcombine.low %v94_v32, %v94_v32  ;;  %v2031_v35 = vcombine.high %v94_v32, %v94_v32  ;;  %v2032_v36 = vcombine.low %v95_v33, %v95_v33  ;;  %v2033_v37 = vcombine.high %v95_v33, %v95_v33  ;;  %v2441_v43 = vld [vmem:[#allocation3 + $0x1f0] sm:$0xff]   ;;  %v2444_v46 = vld [vmem:[#allocation3 + $0x168] sm:$0xff]   ;;  %v2448_v50 = vld [vmem:[#allocation3 + $0x160] sm:$0xff]   ;;  %s2925_s8 = sld [smem:[#allocation9 + $0x1]] }
  0x4a   :  { %v2442_v44 = vld [vmem:[#allocation3 + $0x130] sm:$0xff]   ;;  %v2445_v47 = vld [vmem:[#allocation3 + $0x1e8] sm:$0xff]   ;;  %v2449_v51 = vld [vmem:[#allocation3 + $0x1e0] sm:$0xff]   ;;  %v2756_v13 = vmov 0.0   ;;  %s2927_s29 = sld [smem:[#allocation9 + $0x3]] }
  0x4b   :  { %2278 = vmatpush3.bf16.msra.mxu0 %v2414_v14  ;;  %677 = vmatprep.mubr.bf16.mxu0 %v2031_v35  ;;  %v2443_v45 = vld [vmem:[#allocation3 + $0x1b0] sm:$0xff]   ;;  %v2446_v48 = vld [vmem:[#allocation3 + $0x128] sm:$0xff]   ;;  %v2450_v52 = vld [vmem:[#allocation3 + $0x120] sm:$0xff]   ;;  %s2929_s30 = sld [smem:[#allocation9]] }
  0x4c   :  { %2300 = vmatpush3.bf16.msra.mxu1 %v2415_v15  ;;  %2279 = vmatprep.subr.bf16.mxu0 %v2416_v16  ;;  %v2447_v49 = vld [vmem:[#allocation3 + $0x1a8] sm:$0xff]   ;;  %v2451_v53 = vld [vmem:[#allocation3 + $0x1a0] sm:$0xff]   ;;  %v2452_v54 = vld [vmem:[#allocation3 + $0x158] sm:$0xff]   ;;  %s2931_s14 = sld [smem:[#allocation8 + $0x8]] }
  0x4d   :  { %2301 = vmatprep.subr.bf16.mxu1 %v2417_v17  ;;  %717 = vmatprep.mubr.bf16.mxu1 %v2033_v37  ;;  %v2453_v55 = vld [vmem:[#allocation3 + $0x1d8] sm:$0xff]   ;;  %v2456_v58 = vld [vmem:[#allocation3 + $0x150] sm:$0xff]   ;;  %v2460_v62 = vld [vmem:[#allocation3 + $0x148] sm:$0xff]   ;;  %s2935_s15 = sld [smem:[#allocation8 + $0xf]] }
  0x4e   :  { %v2454_v56 = vld [vmem:[#allocation3 + $0x118] sm:$0xff]   ;;  %v2457_v59 = vld [vmem:[#allocation3 + $0x1d0] sm:$0xff]   ;;  %v2461_v63 = vld [vmem:[#allocation3 + $0x1c8] sm:$0xff]   ;;  %s2941_s16 = sld [smem:[#allocation8 + $0x15]] }
  0x4f   :  { %2280 = vmatpush3.bf16.msra.mxu0 %v2418_v18  ;;  %v2455_v57 = vld [vmem:[#allocation3 + $0x198] sm:$0xff]   ;;  %v2458_v60 = vld [vmem:[#allocation3 + $0x110] sm:$0xff]   ;;  %v2462_v0 = vld [vmem:[#allocation3 + $0x108] sm:$0xff]   ;;  %s2943_s17 = sld [smem:[#allocation8 + $0x17]] }
  0x50   :  { %2302 = vmatpush3.bf16.msra.mxu1 %v2419_v19  ;;  %2281 = vmatprep.subr.bf16.mxu0 %v2420_v20  ;;  %v2459_v61 = vld [vmem:[#allocation3 + $0x190] sm:$0xff]   ;;  %v2463_v1 = vld [vmem:[#allocation3 + $0x188] sm:$0xff]   ;;  %v2464_v2 = vld [vmem:[#allocation3 + $0x140] sm:$0xff]   ;;  %s2950_s12 = sld [smem:[#allocation8 + $0xe]] }
  0x51   :  { %2303 = vmatprep.subr.bf16.mxu1 %v2421_v21  ;;  %v2465_v3 = vld [vmem:[#allocation3 + $0x1c0] sm:$0xff]   ;;  %v96_v6 = vld [vmem:[%s3013_s0 + $0x10] sm:$0xff]  ;;  %v97_v9 = vld [vmem:[%s3013_s0 + $0x18] sm:$0xff]  ;;  %s2905_s0 = sld [smem:[#allocation8 + $0x16]] }
  0x52   :  { %v2466_v4 = vld [vmem:[#allocation3 + $0x100] sm:$0xff]   ;;  %v2034_v7 = vcombine.low %v96_v6, %v96_v6  ;;  %v2035_v8 = vcombine.high %v96_v6, %v96_v6  ;;  %v2036_v10 = vcombine.low %v97_v9, %v97_v9  ;;  %v2037_v11 = vcombine.high %v97_v9, %v97_v9  ;;  %v2472_v12 = vld [vmem:[%s3016_s3 + $0x38] sm:$0xff]   ;;  %v2473_v14 = vld [vmem:[%s3016_s3 + $0x30] sm:$0xff]   ;;  %s2956_s13 = sld [smem:[#allocation8 + $0x12]] }
  0x53   :  { %2282 = vmatpush3.bf16.msra.mxu0 %v2422_v22  ;;  %v2467_v5 = vld [vmem:[#allocation3 + $0x180] sm:$0xff]   ;;  %v2474_v15 = vld [vmem:[%s3016_s3 + $0x28] sm:$0xff]   ;;  %v2476_v17 = vld [vmem:[%s3016_s3 + $0x18] sm:$0xff]  }
  0x54   :  { %2304 = vmatpush3.bf16.msra.mxu1 %v2423_v23  ;;  %2283 = vmatprep.subr.bf16.mxu0 %v2424_v24  ;;  %v2475_v16 = vld [vmem:[%s3016_s3 + $0x20] sm:$0xff]   ;;  %v2477_v18 = vld [vmem:[%s3016_s3 + $0x10] sm:$0xff]   ;;  %v2478_v19 = vld [vmem:[%s3016_s3 + $0x8] sm:$0xff]  }
  0x55   :  { %2305 = vmatprep.subr.bf16.mxu1 %v2425_v25  ;;  %v2479_v20 = vld [vmem:[%s3016_s3] sm:$0xff]   ;;  %v2521_v9 = vld [vmem:[#allocation6 + $0x114] ss:$8 sps:$4 sm:$0xff]   ;;  %s2933_s3 = sld [smem:[#allocation9 + $0x2]] }
  0x56   :  { %v2510_v6 = vld [vmem:[#allocation6 + $0x20] ss:$8 sps:$4 sm:$0xff]  }
  0x57   :  { %2284 = vmatpush3.bf16.msra.mxu0 %v2426_v26 }
  0x58   :  { %2306 = vmatpush3.bf16.msra.mxu1 %v2427_v27  ;;  %2285 = vmatprep.subr.bf16.mxu0 %v2428_v28 }
  0x59   :  { %2307 = vmatprep.subr.bf16.mxu1 %v2429_v29 }
  0x5b   :  { %2286 = vmatpush3.bf16.msra.mxu0 %v2430_v30  ;;  %v2029_v30 = vld [vmem:[%s3015_s2] ss:$0 sm:$0xff]  ;;  %s2937_s2 = sld [smem:[#allocation8 + $0x11]] }
  0x5c   :  { %2308 = vmatpush3.bf16.msra.mxu1 %v2431_v31  ;;  %2315 = vmatprep.subr.bf16.mxu0 %v2436_v38 }
  0x5d   :  { %2337 = vmatprep.subr.bf16.mxu1 %v2437_v39 }
  0x5e   :  { %678 = vmatmul.mubr.bf16.vlgmr.msra.gmra.mxu0 %v2030_v34 }
  0x5f   :  { %718 = vmatmul.mubr.bf16.vlgmr.msra.gmra.mxu1 %v2032_v36  ;;  %2316 = vmatpush3.bf16.msra.mxu0 %v2438_v40 }
  0x60   :  { %2338 = vmatpush3.bf16.msra.mxu1 %v2439_v41  ;;  %2317 = vmatprep.subr.bf16.mxu0 %v2440_v42 }
  0x61   :  { %2339 = vmatprep.subr.bf16.mxu1 %v2441_v43  ;;  %757 = vmatprep.mubr.bf16.mxu0 %v2035_v8  ;;  %v2518_v8 = vld [vmem:[#allocation6 + $0x14] ss:$8 sps:$4 sm:$0xff]  }
  0x62   :  { %797 = vmatprep.mubr.bf16.mxu1 %v2037_v11  ;;  %v2519_v11 = vld [vmem:[#allocation6 + $0x110] ss:$8 sps:$4 sm:$0xff]  }
  0x63   :  { %2318 = vmatpush3.bf16.msra.mxu0 %v2442_v44 }
  0x64   :  { %2340 = vmatpush3.bf16.msra.mxu1 %v2443_v45  ;;  %2319 = vmatprep.subr.bf16.mxu0 %v2444_v46 }
  0x65   :  { %2341 = vmatprep.subr.bf16.mxu1 %v2445_v47 }
  0x67   :  { %2320 = vmatpush3.bf16.msra.mxu0 %v2446_v48  ;;  %v2480_v48 = vld [vmem:[#allocation6 + $0x70] ss:$8 sps:$4 sm:$0xff]  }
  0x68   :  { %2342 = vmatpush3.bf16.msra.mxu1 %v2447_v49  ;;  %2321 = vmatprep.subr.bf16.mxu0 %v2448_v50  ;;  %v2482_v49 = vld [vmem:[#allocation6 + $0x74] ss:$8 sps:$4 sm:$0xff]   ;;  %v2483_v50 = vld [vmem:[#allocation6 + $0x170] ss:$8 sps:$4 sm:$0xff]  }
  0x69   :  { %2343 = vmatprep.subr.bf16.mxu1 %v2449_v51  ;;  %v2485_v51 = vld [vmem:[#allocation6 + $0x174] ss:$8 sps:$4 sm:$0xff]  }
  0x6b   :  { %2322 = vmatpush3.bf16.msra.mxu0 %v2450_v52  ;;  %v2488_v52 = vld [vmem:[#allocation6 + $0x64] ss:$8 sps:$4 sm:$0xff]  }
  0x6c   :  { %2344 = vmatpush3.bf16.msra.mxu1 %v2451_v53  ;;  %2323 = vmatprep.subr.bf16.mxu0 %v2452_v54  ;;  %v2491_v53 = vld [vmem:[#allocation6 + $0x164] ss:$8 sps:$4 sm:$0xff]   ;;  %v2486_v54 = vld [vmem:[#allocation6 + $0x60] ss:$8 sps:$4 sm:$0xff]  }
  0x6d   :  { %2345 = vmatprep.subr.bf16.mxu1 %v2453_v55  ;;  %v2489_v55 = vld [vmem:[#allocation6 + $0x160] ss:$8 sps:$4 sm:$0xff]  }
  0x6f   :  { %2324 = vmatpush3.bf16.msra.mxu0 %v2454_v56  ;;  %v2494_v56 = vld [vmem:[#allocation6 + $0x54] ss:$8 sps:$4 sm:$0xff]  }
  0x70   :  { %2346 = vmatpush3.bf16.msra.mxu1 %v2455_v57  ;;  %2325 = vmatprep.subr.bf16.mxu0 %v2456_v58  ;;  %v2497_v57 = vld [vmem:[#allocation6 + $0x154] ss:$8 sps:$4 sm:$0xff]   ;;  %v2492_v58 = vld [vmem:[#allocation6 + $0x50] ss:$8 sps:$4 sm:$0xff]  }
  0x71   :  { %2347 = vmatprep.subr.bf16.mxu1 %v2457_v59  ;;  %v2495_v59 = vld [vmem:[#allocation6 + $0x150] ss:$8 sps:$4 sm:$0xff]  }
  0x73   :  { %2326 = vmatpush3.bf16.msra.mxu0 %v2458_v60  ;;  %v2500_v60 = vld [vmem:[#allocation6 + $0x44] ss:$8 sps:$4 sm:$0xff]  }
  0x74   :  { %2348 = vmatpush3.bf16.msra.mxu1 %v2459_v61  ;;  %2327 = vmatprep.subr.bf16.mxu0 %v2460_v62  ;;  %v2503_v61 = vld [vmem:[#allocation6 + $0x144] ss:$8 sps:$4 sm:$0xff]   ;;  %v2498_v62 = vld [vmem:[#allocation6 + $0x40] ss:$8 sps:$4 sm:$0xff]  }
  0x75   :  { %2349 = vmatprep.subr.bf16.mxu1 %v2461_v63  ;;  %v2501_v63 = vld [vmem:[#allocation6 + $0x140] ss:$8 sps:$4 sm:$0xff]  }
  0x77   :  { %2328 = vmatpush3.bf16.msra.mxu0 %v2462_v0  ;;  %v2506_v0 = vld [vmem:[#allocation6 + $0x34] ss:$8 sps:$4 sm:$0xff]  }
  0x78   :  { %2350 = vmatpush3.bf16.msra.mxu1 %v2463_v1  ;;  %2329 = vmatprep.subr.bf16.mxu0 %v2464_v2  ;;  %v2509_v1 = vld [vmem:[#allocation6 + $0x134] ss:$8 sps:$4 sm:$0xff]   ;;  %v2504_v2 = vld [vmem:[#allocation6 + $0x30] ss:$8 sps:$4 sm:$0xff]  }
  0x79   :  { %2351 = vmatprep.subr.bf16.mxu1 %v2465_v3  ;;  %v2507_v3 = vld [vmem:[#allocation6 + $0x130] ss:$8 sps:$4 sm:$0xff]  }
  0x7b   :  { %2330 = vmatpush3.bf16.msra.mxu0 %v2466_v4  ;;  %v2512_v4 = vld [vmem:[#allocation6 + $0x24] ss:$8 sps:$4 sm:$0xff]  }
  0x7c   :  { %2352 = vmatpush3.bf16.msra.mxu1 %v2467_v5  ;;  %2368 = vmatprep.subr.bf16.mxu0 %v2756_v13  ;;  %v2515_v5 = vld [vmem:[#allocation6 + $0x124] ss:$8 sps:$4 sm:$0xff]  }
  0x7d   :  { %1826 = vmatprep.subr.bf16.mxu1 %v2482_v49 }
  0x7e   :  { %758 = vmatmul.mubr.bf16.vlgmr.msra.gmra.mxu0 %v2034_v7  ;;  %v2513_v7 = vld [vmem:[#allocation6 + $0x120] ss:$8 sps:$4 sm:$0xff]  }
  0x7f   :  { %798 = vmatmul.mubr.bf16.vlgmr.msra.gmra.mxu1 %v2036_v10  ;;  %2369 = vmatpush3.bf16.msra.mxu0 %v2472_v12  ;;  %v2516_v10 = vld [vmem:[#allocation6 + $0x10] ss:$8 sps:$4 sm:$0xff]   ;;  %v2524_v12 = vld [vmem:[#allocation6 + $0x4] ss:$8 sps:$4 sm:$0xff]  }
  0x80   :  { %2370 = vmatprep.subr.bf16.mxu0 %v2756_v13  ;;  %2384 = vmatprep.mubr.msk.bf16.mxu0 %vm2757_vm0, %v2756_v13 }
  0x81   :  { %1827 = vmatpush1.bf16.msra.mxu1 %v2480_v48  ;;  %v2573_v48 = vld [vmem:[#allocation6 + $0x180] ss:$8 sps:$4 sm:$0xff]  }
  0x82   :  { %1828 = vmatprep.subr.bf16.mxu1 %v2488_v52  ;;  %v2578_v52 = vld [vmem:[#allocation6 + $0x274] ss:$8 sps:$4 sm:$0xff]  }
  0x83   :  { %2371 = vmatpush3.bf16.msra.mxu0 %v2473_v14  ;;  %v2522_v14 = vld [vmem:[#allocation6] ss:$8 sps:$4 sm:$0xff]  }
  0x84   :  { %2372 = vmatprep.subr.bf16.mxu0 %v2756_v13 }
  0x85   :  { %1829 = vmatpush1.bf16.msra.mxu1 %v2486_v54 }
  0x86   :  { %1830 = vmatprep.subr.bf16.mxu1 %v2494_v56  ;;  %v920_v56 = vlaneseq }
  0x87   :  { %2373 = vmatpush3.bf16.msra.mxu0 %v2474_v15  ;;  %v2525_v15 = vld [vmem:[#allocation6 + $0x100] ss:$8 sps:$4 sm:$0xff]  }
  0x88   :  { %2374 = vmatprep.subr.bf16.mxu0 %v2756_v13 }
  0x89   :  { %1831 = vmatpush1.bf16.msra.mxu1 %v2492_v58  ;;  %v949_v58 = vstv %s2895_s19  ;;  %s2961_s19 = sld [smem:[#allocation8 + $0x14]] }
  0x8a   :  { %1832 = vmatprep.subr.bf16.mxu1 %v2500_v60  ;;  %v934_v60 = vstv %s2899_s21 }
  0x8b   :  { %2375 = vmatpush3.bf16.msra.mxu0 %v2475_v16  ;;  %v2530_v16 = vld [vmem:[#allocation6 + $0xf4] ss:$8 sps:$4 sm:$0xff]  }
  0x8c   :  { %2376 = vmatprep.subr.bf16.mxu0 %v2756_v13 }
  0x8d   :  { %1833 = vmatpush1.bf16.msra.mxu1 %v2498_v62 }
  0x8e   :  { %1834 = vmatprep.subr.bf16.mxu1 %v2506_v0  ;;  %v994_v0 = vstv %s2907_s23 }
  0x8f   :  { %2377 = vmatpush3.bf16.msra.mxu0 %v2476_v17  ;;  %v2533_v17 = vld [vmem:[#allocation6 + $0x1f4] ss:$8 sps:$4 sm:$0xff]  }
  0x90   :  { %2378 = vmatprep.subr.bf16.mxu0 %v2756_v13 }
  0x91   :  { %1835 = vmatpush1.bf16.msra.mxu1 %v2504_v2  ;;  %v946_v2 = vstv %s2911_s24 }
  0x92   :  { %1836 = vmatprep.subr.bf16.mxu1 %v2512_v4  ;;  %v931_v4 = vstv %s2915_s26 }
  0x93   :  { %2379 = vmatpush3.bf16.msra.mxu0 %v2477_v18  ;;  %v2528_v18 = vld [vmem:[#allocation6 + $0xf0] ss:$8 sps:$4 sm:$0xff]  }
  0x94   :  { %2380 = vmatprep.subr.bf16.mxu0 %v2756_v13 }
  0x95   :  { %1837 = vmatpush1.bf16.msra.mxu1 %v2510_v6  ;;  %v983_v6 = vstv %s2921_s5 }
  0x96   :  { %1838 = vmatprep.subr.bf16.mxu1 %v2518_v8  ;;  %v961_v8 = vstv %s2917_s27 }
  0x97   :  { %2381 = vmatpush3.bf16.msra.mxu0 %v2478_v19  ;;  %v2531_v19 = vld [vmem:[#allocation6 + $0x1f0] ss:$8 sps:$4 sm:$0xff]  }
  0x98   :  { %2382 = vmatprep.subr.bf16.mxu0 %v2756_v13  ;;  %v2527_v13 = vld [vmem:[#allocation6 + $0x104] ss:$8 sps:$4 sm:$0xff]  }
  0x99   :  { %1839 = vmatpush1.bf16.msra.mxu1 %v2516_v10  ;;  %v957_v10 = vstv %s2925_s8 }
  0x9a   :  { %1840 = vmatprep.subr.bf16.mxu1 %v2524_v12  ;;  %v942_v12 = vstv %s2929_s30 }
  0x9b   :  { %2383 = vmatpush3.bf16.msra.mxu0 %v2479_v20  ;;  %v2536_v20 = vld [vmem:[#allocation6 + $0xe4] ss:$8 sps:$4 sm:$0xff]  }
  0x9c   :  { %1867 = vmatprep.subr.bf16.mxu0 %v2485_v51 }
  0x9d   :  { %1841 = vmatpush1.bf16.msra.mxu1 %v2522_v14 }
  0x9e   :  { %1842 = vmatprep.subr.bf16.mxu1 %v2530_v16  ;;  %v968_v16 = vstv %s2931_s14 }
  0xa1   :  { %1843 = vmatpush2.bf16.msra.mxu1 %v2528_v18  ;;  %v1006_v18 = vstv %s2935_s15 }
  0xa2   :  { %1844 = vmatprep.subr.bf16.mxu1 %v2536_v20 }
 0x11e   :  { %v2287_v21 = vpop.f32.mrf.mxu0 }
 0x11f   :  { %v2309_v22 = vpop.f32.mrf.mxu1 }
 0x120   :  { %v2288_v23 = vpop.f32.mrf.mxu0 }
 0x121   :  { %v2310_v24 = vpop.f32.mrf.mxu1  ;;  %v2289_v29 = vadd.f32 %v2288_v23, %v2287_v21  ;;  %v2539_v21 = vld [vmem:[#allocation6 + $0x1e4] ss:$8 sps:$4 sm:$0xff]   ;;  %v2537_v23 = vld [vmem:[#allocation6 + $0x1e0] ss:$8 sps:$4 sm:$0xff]  }
 0x122   :  { %v2290_v25 = vpop.f32.mrf.mxu0  ;;  %v2311_v32 = vadd.f32 %v2310_v24, %v2309_v22  ;;  %v2534_v22 = vld [vmem:[#allocation6 + $0xe0] ss:$8 sps:$4 sm:$0xff]   ;;  %v2542_v24 = vld [vmem:[#allocation6 + $0xd4] ss:$8 sps:$4 sm:$0xff]  }
 0x123   :  { %v2312_v26 = vpop.f32.mrf.mxu1  ;;  %v680_v31 = vadd.f32 %v2289_v29, %v2029_v30  ;;  %v2545_v25 = vld [vmem:[#allocation6 + $0x1d4] ss:$8 sps:$4 sm:$0xff]   ;;  %1845 = vmatpush2.bf16.msra.mxu1 %v2534_v22  ;;  %v2551_v29 = vld [vmem:[#allocation6 + $0x1c4] ss:$8 sps:$4 sm:$0xff]   ;;  %v2546_v30 = vld [vmem:[#allocation6 + $0xc0] ss:$8 sps:$4 sm:$0xff]  }
 0x124   :  { %v2291_v27 = vpop.f32.mrf.mxu0  ;;  %v2540_v26 = vld [vmem:[#allocation6 + $0xd0] ss:$8 sps:$4 sm:$0xff]   ;;  %1846 = vmatprep.subr.bf16.mxu1 %v2542_v24 }
 0x125   :  { %v2313_v28 = vpop.f32.mrf.mxu1  ;;  %v720_v37 = vadd.f32 %v2311_v32, %v680_v31  ;;  %v2543_v27 = vld [vmem:[#allocation6 + $0x1d0] ss:$8 sps:$4 sm:$0xff]   ;;  %v2549_v31 = vld [vmem:[#allocation6 + $0x1c0] ss:$8 sps:$4 sm:$0xff]   ;;  %v2554_v32 = vld [vmem:[#allocation6 + $0xb4] ss:$8 sps:$4 sm:$0xff]  }
 0x126   :  { %v2548_v28 = vld [vmem:[#allocation6 + $0xc4] ss:$8 sps:$4 sm:$0xff]  }
 0x127   :  { %1847 = vmatpush2.bf16.msra.mxu1 %v2540_v26  ;;  %v1036_v26 = vstv %s2941_s16 }
 0x128   :  { %1848 = vmatprep.subr.bf16.mxu1 %v2548_v28 }
 0x12b   :  { %1849 = vmatpush2.bf16.msra.mxu1 %v2546_v30 }
 0x12c   :  { %1850 = vmatprep.subr.bf16.mxu1 %v2554_v32  ;;  %v998_v32 = vstv %s2950_s12  ;;  %s2128_s12 = sld [smem:[#allocation9 + $0x4]] }
 0x13e   :  { %v2331_v33 = vpop.f32.mrf.mxu0 }
 0x13f   :  { %v2353_v34 = vpop.f32.mrf.mxu1 }
 0x140   :  { %v2332_v35 = vpop.f32.mrf.mxu0 }
 0x141   :  { %v2354_v36 = vpop.f32.mrf.mxu1  ;;  %v2333_v38 = vadd.f32 %v2332_v35, %v2331_v33  ;;  %v2557_v33 = vld [vmem:[#allocation6 + $0x1b4] ss:$8 sps:$4 sm:$0xff]   ;;  %v2555_v35 = vld [vmem:[#allocation6 + $0x1b0] ss:$8 sps:$4 sm:$0xff]  }
 0x142   :  { %v2334_v39 = vpop.f32.mrf.mxu0  ;;  %v2355_v42 = vadd.f32 %v2354_v36, %v2353_v34  ;;  %v2552_v34 = vld [vmem:[#allocation6 + $0xb0] ss:$8 sps:$4 sm:$0xff]   ;;  %v2558_v36 = vld [vmem:[#allocation6 + $0xa0] ss:$8 sps:$4 sm:$0xff]  }
 0x143   :  { %v2356_v40 = vpop.f32.mrf.mxu1  ;;  %v760_v41 = vadd.f32 %v2333_v38, %v720_v37  ;;  %1851 = vmatpush2.bf16.msra.mxu1 %v2552_v34  ;;  %v2560_v37 = vld [vmem:[#allocation6 + $0xa4] ss:$8 sps:$4 sm:$0xff]   ;;  %v2561_v38 = vld [vmem:[#allocation6 + $0x1a0] ss:$8 sps:$4 sm:$0xff]  }
 0x144   :  { %v2335_v43 = vpop.f32.mrf.mxu0  ;;  %v2563_v39 = vld [vmem:[#allocation6 + $0x1a4] ss:$8 sps:$4 sm:$0xff]   ;;  %1852 = vmatprep.subr.bf16.mxu1 %v2560_v37  ;;  %v2564_v40 = vld [vmem:[#allocation6 + $0x90] ss:$8 sps:$4 sm:$0xff]  }
 0x145   :  { %v2357_v44 = vpop.f32.mrf.mxu1  ;;  %v800_v45 = vadd.f32 %v2355_v42, %v760_v41  ;;  %v2566_v41 = vld [vmem:[#allocation6 + $0x94] ss:$8 sps:$4 sm:$0xff]   ;;  %v2567_v42 = vld [vmem:[#allocation6 + $0x190] ss:$8 sps:$4 sm:$0xff]  }
 0x146   :  { %v2569_v43 = vld [vmem:[#allocation6 + $0x194] ss:$8 sps:$4 sm:$0xff]   ;;  %v2572_v44 = vld [vmem:[#allocation6 + $0x84] ss:$8 sps:$4 sm:$0xff]  }
 0x147   :  { %v805_v46 = vmax.f32 %v800_v45, 0.0  ;;  %1853 = vmatpush2.bf16.msra.mxu1 %v2558_v36  ;;  %v2575_v45 = vld [vmem:[#allocation6 + $0x184] ss:$8 sps:$4 sm:$0xff]  }
 0x148   :  { %1854 = vmatprep.subr.bf16.mxu1 %v2566_v41 }
 0x149   :  { %806 = vst [vmem:[%s3023_s10] sm:$0xff] %v805_v46  ;;  %v807_v47 = vpack.c.bf16 %v805_v46, %v805_v46  ;;  %v2570_v46 = vld [vmem:[#allocation6 + $0x80] ss:$8 sps:$4 sm:$0xff]   ;;  %s2939_s10 = sld [smem:[#allocation9 + $0x5]] }
 0x14b   :  { %2385 = vmatmul.mubr.bf16.vlgmr.msra.gmra.mxu0 %v807_v47  ;;  %1855 = vmatpush2.bf16.msra.mxu1 %v2564_v40  ;;  %v2102_v47 = vld [vmem:[%s3017_s4] ss:$0 sm:$0xff]  ;;  %s2759_s4 = smov 127  }
 0x14c   :  { %1868 = vmatpush1.bf16.msra.mxu0 %v2483_v50  ;;  %1856 = vmatprep.subr.bf16.mxu1 %v2572_v44 }
 0x14d   :  { %1869 = vmatprep.subr.bf16.mxu0 %v2491_v53  ;;  %v2581_v53 = vld [vmem:[#allocation6 + $0x374] ss:$8 sps:$4 sm:$0xff]  }
 0x14f   :  { %1857 = vmatpush2.bf16.msra.mxu1 %v2570_v46  ;;  %v1017_v22 = vstv %s2939_s10 }
 0x150   :  { %1870 = vmatpush1.bf16.msra.mxu0 %v2489_v55  ;;  %1908 = vmatprep.subr.bf16.mxu1 %v2578_v52 }
 0x151   :  { %1871 = vmatprep.subr.bf16.mxu0 %v2497_v57  ;;  %v921_v57 = vand.u32 127, %v920_v56 }
 0x153   :  { %vm922_vm1 = vcmp.eq.s32.totalorder %v921_v57, 0  ;;  %vm926_vm2 = vcmp.eq.s32.totalorder %v921_v57, 127 }
 0x154   :  { %1872 = vmatpush1.bf16.msra.mxu0 %v2495_v59  ;;  %v979_v59 = vstv %s2897_s20 }
 0x155   :  { %1873 = vmatprep.subr.bf16.mxu0 %v2503_v61  ;;  %v964_v61 = vstv %s2901_s22 }
 0x158   :  { %1874 = vmatpush1.bf16.msra.mxu0 %v2501_v63  ;;  %v1039_v63 = vstv %s2905_s0 }
 0x159   :  { %1875 = vmatprep.subr.bf16.mxu0 %v2509_v1  ;;  %v1024_v1 = vstv %s2909_s1  ;;  %s3029_s1 = sld [smem:[#allocation16_spill]] }
 0x15c   :  { %1876 = vmatpush1.bf16.msra.mxu0 %v2507_v3  ;;  %v976_v3 = vstv %s2913_s25 }
 0x15d   :  { %1877 = vmatprep.subr.bf16.mxu0 %v2515_v5  ;;  %v953_v5 = vstv %s2919_s28 }
 0x160   :  { %1878 = vmatpush1.bf16.msra.mxu0 %v2513_v7  ;;  %v938_v7 = vstv %s2923_s7 }
 0x161   :  { %1879 = vmatprep.subr.bf16.mxu0 %v2521_v9 }
 0x164   :  { %1880 = vmatpush1.bf16.msra.mxu0 %v2519_v11  ;;  %v987_v11 = vstv %s2927_s29 }
 0x165   :  { %1881 = vmatprep.subr.bf16.mxu0 %v2527_v13 }
 0x168   :  { %1882 = vmatpush1.bf16.msra.mxu0 %v2525_v15 }
 0x169   :  { %1883 = vmatprep.subr.bf16.mxu0 %v2533_v17  ;;  %v972_v17 = vstv %s2933_s3 }
 0x16c   :  { %1884 = vmatpush2.bf16.msra.mxu0 %v2531_v19 }
 0x16d   :  { %1885 = vmatprep.subr.bf16.mxu0 %v2539_v21  ;;  %v1013_v21 = vstv %s2937_s2 }
 0x170   :  { %1886 = vmatpush2.bf16.msra.mxu0 %v2537_v23 }
 0x171   :  { %1887 = vmatprep.subr.bf16.mxu0 %v2545_v25 }
 0x174   :  { %1888 = vmatpush2.bf16.msra.mxu0 %v2543_v27  ;;  %v1043_v27 = vstv %s2943_s17 }
 0x175   :  { %1889 = vmatprep.subr.bf16.mxu0 %v2551_v29  ;;  %v1021_v29 = vstv %s2956_s13  ;;  %s2136_s13 = sld [smem:[#allocation9 + $0x6]] }
 0x178   :  { %1890 = vmatpush2.bf16.msra.mxu0 %v2549_v31 }
 0x179   :  { %1891 = vmatprep.subr.bf16.mxu0 %v2557_v33  ;;  %v1028_v33 = vstv %s2961_s19 }
 0x17c   :  { %1892 = vmatpush2.bf16.msra.mxu0 %v2555_v35 }
 0x17d   :  { %1893 = vmatprep.subr.bf16.mxu0 %v2563_v39 }
 0x180   :  { %1894 = vmatpush2.bf16.msra.mxu0 %v2561_v38 }
 0x181   :  { %1895 = vmatprep.subr.bf16.mxu0 %v2569_v43 }
 0x184   :  { %1896 = vmatpush2.bf16.msra.mxu0 %v2567_v42 }
 0x185   :  { %1897 = vmatprep.subr.bf16.mxu0 %v2575_v45 }
 0x188   :  { %1898 = vmatpush2.bf16.msra.mxu0 %v2573_v48 }
 0x189   :  { %1949 = vmatprep.subr.bf16.mxu0 %v2581_v53 }
 0x20b   :  { %v913_v49 = vpop.f32.mrf.mxu0 }
 0x20c   :  { %v2887_v50 = vadd.f32 %v2102_v47, %v913_v49 }
 0x20d   :  { %v2386_v51 = vpop.f32.mrf.mxu0 }
 0x20e   :  { %919 = vst [vmem:[%s3024_s11] sm:$0xff] %v2887_v50  ;;  %923 = vrot.lane.b32.xlu0 %v2887_v50, %s2758_s18  ;;  %s2903_s11 = sld [smem:[#allocation8 + $0x10]]  ;;  %v950_v9 = vmul.f32 %v949_v58, %v2887_v50  ;;  %v980_v13 = vmul.f32 %v979_v59, %v2887_v50  ;;  %v935_v14 = vmul.f32 %v934_v60, %v2887_v50 }
 0x20f   :  { %v916_v54 = vpop.f32.mrf.mxu0  ;;  %s2945_s18 = sld [smem:[#allocation9 + $0x7]]  ;;  %v965_v15 = vmul.f32 %v964_v61, %v2887_v50  ;;  %v1040_v20 = vmul.f32 %v1039_v63, %v2887_v50  ;;  %v995_v23 = vmul.f32 %v994_v0, %v2887_v50  ;;  %v1025_v24 = vmul.f32 %v1024_v1, %v2887_v50 }
 0x211   :  { %v2387_v55 = vpop.f32.mrf.mxu0 }
 0x212   :  { %927 = vrot.lane.b32.xlu0 %v2887_v50, %s2759_s4  ;;  %s2947_s4 = sld [smem:[#allocation8 + $0xc]] }
 0x214   :  { %v1009_v62 = vstv %s2903_s11 }
 0x215   :  { %v1010_v19 = vmul.f32 %v1009_v62, %v2887_v50  ;;  %v1047_v31 = vstv %s2945_s18 }
 0x218   :  { %v991_v28 = vstv %s2947_s4 }
 0x280   :  { %v924_v25 = vpop.permute.xlu0 %923 }
 0x281   :  { %v925_v30 = vsel %vm922_vm1, 0.0, %v924_v25 }
 0x282   :  { %v947_v34 = vmul.f32 %v946_v2, %v925_v30  ;;  %v977_v35 = vmul.f32 %v976_v3, %v925_v30  ;;  %v932_v36 = vmul.f32 %v931_v4, %v925_v30  ;;  %v962_v37 = vmul.f32 %v961_v8, %v925_v30 }
 0x283   :  { %v1007_v38 = vmul.f32 %v1006_v18, %v925_v30  ;;  %v1037_v39 = vmul.f32 %v1036_v26, %v925_v30  ;;  %v992_v40 = vmul.f32 %v991_v28, %v925_v30  ;;  %v1022_v41 = vmul.f32 %v1021_v29, %v925_v30  ;;  %v2590_v28 = vld [vmem:[#allocation6 + $0x254] ss:$8 sps:$4 sm:$0xff]   ;;  %v2588_v30 = vld [vmem:[#allocation6 + $0x250] ss:$8 sps:$4 sm:$0xff]  }
 0x284   :  { %v928_v42 = vpop.permute.xlu0 %927  ;;  %v951_v43 = vadd.f32 %v950_v9, %v947_v34  ;;  %v981_v44 = vadd.f32 %v980_v13, %v977_v35  ;;  %v936_v45 = vadd.f32 %v935_v14, %v932_v36  ;;  %v966_v46 = vadd.f32 %v965_v15, %v962_v37  ;;  %v2593_v29 = vld [vmem:[#allocation6 + $0x354] ss:$8 sps:$4 sm:$0xff]   ;;  %v2594_v34 = vld [vmem:[#allocation6 + $0x240] ss:$8 sps:$4 sm:$0xff]  }
 0x285   :  { %v929_v47 = vsel %vm926_vm2, 0.0, %v928_v42  ;;  %v1011_v48 = vadd.f32 %v1010_v19, %v1007_v38  ;;  %v1041_v49 = vadd.f32 %v1040_v20, %v1037_v39  ;;  %v996_v50 = vadd.f32 %v995_v23, %v992_v40  ;;  %v2576_v23 = vld [vmem:[#allocation6 + $0x270] ss:$8 sps:$4 sm:$0xff]   ;;  %v2597_v35 = vld [vmem:[#allocation6 + $0x340] ss:$8 sps:$4 sm:$0xff]  }
 0x286   :  { %v954_v51 = vmul.f32 %v953_v5, %v929_v47  ;;  %v984_v52 = vmul.f32 %v983_v6, %v929_v47  ;;  %v939_v53 = vmul.f32 %v938_v7, %v929_v47  ;;  %v969_v54 = vmul.f32 %v968_v16, %v929_v47  ;;  %v2602_v36 = vld [vmem:[#allocation6 + $0x234] ss:$8 sps:$4 sm:$0xff]   ;;  %v2600_v38 = vld [vmem:[#allocation6 + $0x230] ss:$8 sps:$4 sm:$0xff]   ;;  %v2608_v40 = vld [vmem:[#allocation6 + $0x224] ss:$8 sps:$4 sm:$0xff]  }
 0x287   :  { %v1014_v55 = vmul.f32 %v1013_v21, %v929_v47  ;;  %v1044_v56 = vmul.f32 %v1043_v27, %v929_v47  ;;  %v999_v58 = vmul.f32 %v998_v32, %v929_v47  ;;  %v1026_v59 = vadd.f32 %v1025_v24, %v1022_v41  ;;  %v2579_v24 = vld [vmem:[#allocation6 + $0x370] ss:$8 sps:$4 sm:$0xff]   ;;  %v2585_v27 = vld [vmem:[#allocation6 + $0x360] ss:$8 sps:$4 sm:$0xff]   ;;  %v2596_v32 = vld [vmem:[#allocation6 + $0x244] ss:$8 sps:$4 sm:$0xff]  }
 0x288   :  { %v955_v60 = vadd.f32 %v954_v51, %v951_v43  ;;  %v985_v61 = vadd.f32 %v984_v52, %v981_v44  ;;  %v940_v62 = vadd.f32 %v939_v53, %v936_v45  ;;  %v970_v63 = vadd.f32 %v969_v54, %v966_v46  ;;  %v2605_v37 = vld [vmem:[#allocation6 + $0x334] ss:$8 sps:$4 sm:$0xff]   ;;  %v2603_v39 = vld [vmem:[#allocation6 + $0x330] ss:$8 sps:$4 sm:$0xff]   ;;  %v2611_v41 = vld [vmem:[#allocation6 + $0x324] ss:$8 sps:$4 sm:$0xff]  }
 0x289   :  { %v1015_v0 = vadd.f32 %v1014_v55, %v1011_v48  ;;  %v1045_v1 = vadd.f32 %v1044_v56, %v1041_v49  ;;  %v2995_v2 = vadd.f32 %v999_v58, %v996_v50  ;;  %v1029_v57 = vmul.f32 %v1028_v33, %v929_v47  ;;  %v2599_v33 = vld [vmem:[#allocation6 + $0x344] ss:$8 sps:$4 sm:$0xff]   ;;  %v2606_v42 = vld [vmem:[#allocation6 + $0x220] ss:$8 sps:$4 sm:$0xff]   ;;  %v2614_v44 = vld [vmem:[#allocation6 + $0x214] ss:$8 sps:$4 sm:$0xff]  }
 0x28a   :  { %v958_v3 = vadd.f32 %v957_v10, %v955_v60  ;;  %v988_v4 = vadd.f32 %v987_v11, %v985_v61  ;;  %v943_v8 = vadd.f32 %v942_v12, %v940_v62  ;;  %v973_v5 = vadd.f32 %v972_v17, %v970_v63  ;;  %v2584_v10 = vld [vmem:[#allocation6 + $0x264] ss:$8 sps:$4 sm:$0xff]   ;;  %v2609_v43 = vld [vmem:[#allocation6 + $0x320] ss:$8 sps:$4 sm:$0xff]   ;;  %v2617_v45 = vld [vmem:[#allocation6 + $0x314] ss:$8 sps:$4 sm:$0xff]  }
 0x28b   :  { %v1018_v6 = vadd.f32 %v1017_v22, %v1015_v0  ;;  %v1048_v7 = vadd.f32 %v1047_v31, %v1045_v1  ;;  %v2997_v9 = vadd.f32 %v1029_v57, %v1026_v59  ;;  %v2587_v11 = vld [vmem:[#allocation6 + $0x364] ss:$8 sps:$4 sm:$0xff]   ;;  %v2582_v22 = vld [vmem:[#allocation6 + $0x260] ss:$8 sps:$4 sm:$0xff]   ;;  %v2591_v31 = vld [vmem:[#allocation6 + $0x350] ss:$8 sps:$4 sm:$0xff]  }
 0x28c   :  { %v959_v13 = vmax.f32 %v958_v3, 0.0  ;;  %v989_v14 = vmax.f32 %v988_v4, 0.0  ;;  %v944_v15 = vmax.f32 %v943_v8, 0.0  ;;  %v974_v16 = vmax.f32 %v973_v5, 0.0  ;;  %v2612_v46 = vld [vmem:[#allocation6 + $0x210] ss:$8 sps:$4 sm:$0xff]  }
 0x28d   :  { %v1019_v18 = vmax.f32 %v1018_v6, 0.0  ;;  %v1049_v19 = vmax.f32 %v1048_v7, 0.0  ;;  %v2615_v47 = vld [vmem:[#allocation6 + $0x310] ss:$8 sps:$4 sm:$0xff]   ;;  %v2620_v48 = vld [vmem:[#allocation6 + $0x204] ss:$8 sps:$4 sm:$0xff]  }
 0x28e   :  { %v1051_v20 = vpack.c.bf16 %v959_v13, %v959_v13  ;;  %v1053_v21 = vpack.c.bf16 %v989_v14, %v989_v14  ;;  %v1050_v25 = vpack.c.bf16 %v944_v15, %v944_v15  ;;  %v1052_v26 = vpack.c.bf16 %v974_v16, %v974_v16  ;;  %v2623_v49 = vld [vmem:[#allocation6 + $0x304] ss:$8 sps:$4 sm:$0xff]   ;;  %v2618_v50 = vld [vmem:[#allocation6 + $0x200] ss:$8 sps:$4 sm:$0xff]   ;;  %v2626_v52 = vld [vmem:[#allocation6 + $0x2f4] ss:$8 sps:$4 sm:$0xff]  }
 0x28f   :  { %v1055_v12 = vpack.c.bf16 %v1019_v18, %v1019_v18  ;;  %v1057_v17 = vpack.c.bf16 %v1049_v19, %v1049_v19  ;;  %v2621_v51 = vld [vmem:[#allocation6 + $0x300] ss:$8 sps:$4 sm:$0xff]   ;;  %v2629_v53 = vld [vmem:[#allocation6 + $0x3f4] ss:$8 sps:$4 sm:$0xff]   ;;  %v2624_v54 = vld [vmem:[#allocation6 + $0x2f0] ss:$8 sps:$4 sm:$0xff]  }
 0x290   :  { %1858 = vmatprep.mubr.bf16.mxu1 %v1051_v20  ;;  %1899 = vmatprep.mubr.bf16.mxu0 %v1053_v21  ;;  %v2627_v55 = vld [vmem:[#allocation6 + $0x3f0] ss:$8 sps:$4 sm:$0xff]   ;;  %v2632_v56 = vld [vmem:[#allocation6 + $0x2e4] ss:$8 sps:$4 sm:$0xff]   ;;  %v2630_v59 = vld [vmem:[#allocation6 + $0x2e0] ss:$8 sps:$4 sm:$0xff]   ;;  %v1002_v20 = vstv %s2128_s12  ;;  %v1032_v21 = vstv %s2136_s13 }
 0x291   :  { %1859 = vmatmul.mubr.bf16.vlgmr.msra.gmra.mxu1 %v1050_v25  ;;  %1900 = vmatmul.mubr.bf16.vlgmr.msra.gmra.mxu0 %v1052_v26  ;;  %v2635_v58 = vld [vmem:[#allocation6 + $0x3e4] ss:$8 sps:$4 sm:$0xff]   ;;  %v2633_v60 = vld [vmem:[#allocation6 + $0x3e0] ss:$8 sps:$4 sm:$0xff]   ;;  %v2638_v61 = vld [vmem:[#allocation6 + $0x2d4] ss:$8 sps:$4 sm:$0xff]  }
 0x292   :  { %1909 = vmatpush1.bf16.msra.mxu1 %v2576_v23  ;;  %1950 = vmatpush1.bf16.msra.mxu0 %v2579_v24  ;;  %v2641_v62 = vld [vmem:[#allocation6 + $0x3d4] ss:$8 sps:$4 sm:$0xff]   ;;  %v2636_v63 = vld [vmem:[#allocation6 + $0x2d0] ss:$8 sps:$4 sm:$0xff]   ;;  %v2644_v1 = vld [vmem:[#allocation6 + $0x2c4] ss:$8 sps:$4 sm:$0xff]  }
 0x293   :  { %1940 = vmatprep.mubr.bf16.mxu1 %v1055_v12  ;;  %1981 = vmatprep.mubr.bf16.mxu0 %v1057_v17  ;;  %v2639_v0 = vld [vmem:[#allocation6 + $0x3d0] ss:$8 sps:$4 sm:$0xff]   ;;  %v2647_v57 = vld [vmem:[#allocation6 + $0x3c4] ss:$8 sps:$4 sm:$0xff]   ;;  %v2642_v3 = vld [vmem:[#allocation6 + $0x2c0] ss:$8 sps:$4 sm:$0xff]  }
 0x294   :  { %1910 = vmatprep.subr.bf16.mxu1 %v2584_v10  ;;  %1951 = vmatprep.subr.bf16.mxu0 %v2587_v11  ;;  %v2645_v4 = vld [vmem:[#allocation6 + $0x3c0] ss:$8 sps:$4 sm:$0xff]   ;;  %v2650_v8 = vld [vmem:[#allocation6 + $0x2b4] ss:$8 sps:$4 sm:$0xff]   ;;  %v2648_v6 = vld [vmem:[#allocation6 + $0x2b0] ss:$8 sps:$4 sm:$0xff]   ;;  %v1003_v10 = vadd.f32 %v1002_v20, %v2995_v2  ;;  %v1033_v11 = vadd.f32 %v1032_v21, %v2997_v9 }
 0x295   :  { %v2653_v5 = vld [vmem:[#allocation6 + $0x3b4] ss:$8 sps:$4 sm:$0xff]   ;;  %v2651_v7 = vld [vmem:[#allocation6 + $0x3b0] ss:$8 sps:$4 sm:$0xff]   ;;  %v2656_v13 = vld [vmem:[#allocation6 + $0x2a4] ss:$8 sps:$4 sm:$0xff]  }
 0x296   :  { %1911 = vmatpush1.bf16.msra.mxu1 %v2582_v22  ;;  %1952 = vmatpush1.bf16.msra.mxu0 %v2585_v27  ;;  %v2659_v14 = vld [vmem:[#allocation6 + $0x3a4] ss:$8 sps:$4 sm:$0xff]   ;;  %v2654_v15 = vld [vmem:[#allocation6 + $0x2a0] ss:$8 sps:$4 sm:$0xff]   ;;  %v2662_v18 = vld [vmem:[#allocation6 + $0x294] ss:$8 sps:$4 sm:$0xff]  }
 0x297   :  { %1912 = vmatprep.subr.bf16.mxu1 %v2590_v28  ;;  %1953 = vmatprep.subr.bf16.mxu0 %v2593_v29  ;;  %v2657_v16 = vld [vmem:[#allocation6 + $0x3a0] ss:$8 sps:$4 sm:$0xff]   ;;  %v2665_v19 = vld [vmem:[#allocation6 + $0x394] ss:$8 sps:$4 sm:$0xff]   ;;  %v2660_v23 = vld [vmem:[#allocation6 + $0x290] ss:$8 sps:$4 sm:$0xff]  }
 0x298   :  { %v2663_v24 = vld [vmem:[#allocation6 + $0x390] ss:$8 sps:$4 sm:$0xff]   ;;  %v2668_v25 = vld [vmem:[#allocation6 + $0x284] ss:$8 sps:$4 sm:$0xff]   ;;  %v2666_v12 = vld [vmem:[#allocation6 + $0x280] ss:$8 sps:$4 sm:$0xff]  }
 0x299   :  { %v2671_v26 = vld [vmem:[#allocation6 + $0x384] ss:$8 sps:$4 sm:$0xff]   ;;  %v2669_v17 = vld [vmem:[#allocation6 + $0x380] ss:$8 sps:$4 sm:$0xff]   ;;  %v1004_v22 = vmax.f32 %v1003_v10, 0.0  ;;  %v1034_v27 = vmax.f32 %v1033_v11, 0.0 }
 0x29a   :  { %1913 = vmatpush1.bf16.msra.mxu1 %v2588_v30  ;;  %1954 = vmatpush1.bf16.msra.mxu0 %v2591_v31 }
 0x29b   :  { %1914 = vmatprep.subr.bf16.mxu1 %v2596_v32  ;;  %1955 = vmatprep.subr.bf16.mxu0 %v2599_v33  ;;  %v1054_v28 = vpack.c.bf16 %v1004_v22, %v1004_v22  ;;  %v1056_v29 = vpack.c.bf16 %v1034_v27, %v1034_v27 }
 0x29e   :  { %1915 = vmatpush1.bf16.msra.mxu1 %v2594_v34  ;;  %1956 = vmatpush1.bf16.msra.mxu0 %v2597_v35 }
 0x29f   :  { %1916 = vmatprep.subr.bf16.mxu1 %v2602_v36  ;;  %1957 = vmatprep.subr.bf16.mxu0 %v2605_v37 }
 0x2a2   :  { %1917 = vmatpush1.bf16.msra.mxu1 %v2600_v38  ;;  %1958 = vmatpush1.bf16.msra.mxu0 %v2603_v39 }
 0x2a3   :  { %1918 = vmatprep.subr.bf16.mxu1 %v2608_v40  ;;  %1959 = vmatprep.subr.bf16.mxu0 %v2611_v41  ;;  %v2269_v41 = vld [vmem:[%s3019_s6] ss:$0 sm:$0xff] }
 0x2a6   :  { %1919 = vmatpush1.bf16.msra.mxu1 %v2606_v42  ;;  %1960 = vmatpush1.bf16.msra.mxu0 %v2609_v43 }
 0x2a7   :  { %1920 = vmatprep.subr.bf16.mxu1 %v2614_v44  ;;  %1961 = vmatprep.subr.bf16.mxu0 %v2617_v45 }
 0x2aa   :  { %1921 = vmatpush1.bf16.msra.mxu1 %v2612_v46  ;;  %1962 = vmatpush1.bf16.msra.mxu0 %v2615_v47  ;;  %v2000_v46 = vstv %s3022_s9  ;;  %s3030_s9 = sld [smem:[#allocation15_spill]] }
 0x2ab   :  { %1922 = vmatprep.subr.bf16.mxu1 %v2620_v48  ;;  %1963 = vmatprep.subr.bf16.mxu0 %v2623_v49 }
 0x2ae   :  { %1923 = vmatpush1.bf16.msra.mxu1 %v2618_v50  ;;  %1964 = vmatpush1.bf16.msra.mxu0 %v2621_v51 }
 0x2af   :  { %1924 = vmatprep.subr.bf16.mxu1 %v2626_v52  ;;  %1965 = vmatprep.subr.bf16.mxu0 %v2629_v53 }
 0x2b2   :  { %1925 = vmatpush2.bf16.msra.mxu1 %v2624_v54  ;;  %1966 = vmatpush2.bf16.msra.mxu0 %v2627_v55 }
 0x2b3   :  { %1926 = vmatprep.subr.bf16.mxu1 %v2632_v56  ;;  %1967 = vmatprep.subr.bf16.mxu0 %v2635_v58 }
 0x2b6   :  { %1927 = vmatpush2.bf16.msra.mxu1 %v2630_v59  ;;  %1968 = vmatpush2.bf16.msra.mxu0 %v2633_v60 }
 0x2b7   :  { %1928 = vmatprep.subr.bf16.mxu1 %v2638_v61  ;;  %1969 = vmatprep.subr.bf16.mxu0 %v2641_v62 }
 0x2ba   :  { %1929 = vmatpush2.bf16.msra.mxu1 %v2636_v63  ;;  %1970 = vmatpush2.bf16.msra.mxu0 %v2639_v0 }
 0x2bb   :  { %1930 = vmatprep.subr.bf16.mxu1 %v2644_v1  ;;  %1971 = vmatprep.subr.bf16.mxu0 %v2647_v57 }
 0x2be   :  { %1931 = vmatpush2.bf16.msra.mxu1 %v2642_v3  ;;  %1972 = vmatpush2.bf16.msra.mxu0 %v2645_v4 }
 0x2bf   :  { %1932 = vmatprep.subr.bf16.mxu1 %v2650_v8  ;;  %1973 = vmatprep.subr.bf16.mxu0 %v2653_v5 }
 0x2c2   :  { %1933 = vmatpush2.bf16.msra.mxu1 %v2648_v6  ;;  %1974 = vmatpush2.bf16.msra.mxu0 %v2651_v7 }
 0x2c3   :  { %1934 = vmatprep.subr.bf16.mxu1 %v2656_v13  ;;  %1975 = vmatprep.subr.bf16.mxu0 %v2659_v14 }
 0x2c6   :  { %1935 = vmatpush2.bf16.msra.mxu1 %v2654_v15  ;;  %1976 = vmatpush2.bf16.msra.mxu0 %v2657_v16 }
 0x2c7   :  { %1936 = vmatprep.subr.bf16.mxu1 %v2662_v18  ;;  %1977 = vmatprep.subr.bf16.mxu0 %v2665_v19 }
 0x2ca   :  { %1937 = vmatpush2.bf16.msra.mxu1 %v2660_v23  ;;  %1978 = vmatpush2.bf16.msra.mxu0 %v2663_v24 }
 0x2cb   :  { %1938 = vmatprep.subr.bf16.mxu1 %v2668_v25  ;;  %1979 = vmatprep.subr.bf16.mxu0 %v2671_v26 }
 0x2ce   :  { %1939 = vmatpush2.bf16.msra.mxu1 %v2666_v12  ;;  %1980 = vmatpush2.bf16.msra.mxu0 %v2669_v17 }
 0x2d1   :  { %1941 = vmatmul.mubr.bf16.vlgmr.msra.gmra.mxu1 %v1054_v28  ;;  %1982 = vmatmul.mubr.bf16.vlgmr.msra.gmra.mxu0 %v1056_v29 }
 0x351   :  { %v1860_v30 = vpop.f32.mrf.mxu1  ;;  %v1901_v31 = vpop.f32.mrf.mxu0 }
 0x352   :  { %v1902_v36 = vadd.f32 %v1901_v31, %v1860_v30 }
 0x353   :  { %v1862_v32 = vpop.f32.mrf.mxu1  ;;  %v1903_v2 = vpop.f32.mrf.mxu0 }
 0x354   :  { %v1904_v39 = vadd.f32 %v1903_v2, %v1862_v32 }
 0x355   :  { %v1864_v33 = vpop.f32.mrf.mxu1  ;;  %v1905_v9 = vpop.f32.mrf.mxu0 }
 0x357   :  { %v1865_v34 = vpop.f32.mrf.mxu1  ;;  %v1906_v35 = vpop.f32.mrf.mxu0 }
 0x391   :  { %v1942_v37 = vpop.f32.mrf.mxu1  ;;  %v1983_v38 = vpop.f32.mrf.mxu0 }
 0x392   :  { %v1943_v40 = vadd.f32 %v1942_v37, %v1902_v36 }
 0x393   :  { %v1944_v42 = vpop.f32.mrf.mxu1  ;;  %v1985_v43 = vpop.f32.mrf.mxu0 }
 0x394   :  { %v1984_v44 = vadd.f32 %v1983_v38, %v1943_v40  ;;  %v1945_v45 = vadd.f32 %v1944_v42, %v1904_v39 }
 0x395   :  { %v1946_v47 = vpop.f32.mrf.mxu1  ;;  %v1987_v48 = vpop.f32.mrf.mxu0 }
 0x396   :  { %v1997_v49 = vadd.f32 %v2269_v41, %v1984_v44  ;;  %v1986_v50 = vadd.f32 %v1985_v43, %v1945_v45 }
 0x397   :  { %v1947_v51 = vpop.f32.mrf.mxu1  ;;  %v1988_v52 = vpop.f32.mrf.mxu0 }
 0x398   :  { %1998 = vst [vmem:[%s3029_s1] sm:$0xff] %v1997_v49  ;;  %v2001_v53 = vadd.f32 %v2000_v46, %v1986_v50 }
 0x39a   :  { %v2270_v54 = vmul.f32 -1.442695, %v2001_v53 }
 0x39c   :  { %2672 = vpow2.f32 %v2270_v54 }
 0x3a9   :  { %v2673_v55 = vpop.eup %2672 }
 0x3aa   :  { %v2005_v56 = vadd.f32 1.0, %v2673_v55 }
 0x3ac   :  { %2674 = vrcp.f32 %v2005_v56 }
 0x3b9   :  { %v2675_v58 = vpop.eup %2674 }
 0x3ba   :  { %2008 = vst [vmem:[%s3030_s9] sm:$0xff] %v2675_v58 }
 0x3bb   :  { %2025 = vsyncpa [#allocation4], 1 }
 0x3bc   :  { %2026 = vsyncpa [#allocation7], 1 }
 0x3bd   :  { %2027 = vsyncpa [#allocation5], 1 }
 0x3be   :  { %2028 = vsyncpa [#allocation10], 1 }

</bundles_post_ra>
